<compile_context>
chip_gen: v6e
topology: v6e:2x2x1
jax: 0.10.0
libtpu: 0.0.40
codegen_flags: <defaults>
</compile_context>

<pallas_src>
import numpy as np
import jax
import jax.numpy as jnp
from jax import lax
from jax.experimental import pallas as pl
from jax.experimental.pallas import tpu as pltpu


def _round_up(x, m):
    return ((x + m - 1) // m) * m


def _mxu_lane_granularity():
    """Native MXU contraction tile: 256 on v6e/v7x, 128 on v4/v5."""
    try:
        kind = jax.devices()[0].device_kind.lower()
    except Exception:
        return 256
    return 256 if ("v6" in kind or "v7" in kind) else 128


def _choose_split(n, gran):
    """Pick Cooley-Tukey radix N1 in {1,2,4} minimising effective MXU work."""
    best = None
    for n1 in (1, 2, 4):
        if n % n1:
            continue
        s = _round_up(n // n1, 128)
        padded = n1 * s
        # per-slab matmul cost with the contraction rounded to MXU granularity
        cost = n1 * s * _round_up(s, gran) * padded
        key = (cost, padded, n1)
        if best is None or key < best[0]:
            best = (key, n1, s, padded)
    return best[1], best[2], best[3]


def _radix_dft(n1):
    """Exact small DFT matrix for the butterfly stage (entries in {0, +-1, +-i})."""
    if n1 == 4:
        return np.array([[(-1j) ** ((k * n) % 4) for n in range(4)]
                         for k in range(4)], dtype=np.complex128)
    if n1 == 2:
        return np.array([[1, 1], [1, -1]], dtype=np.complex128)
    return np.array([[1.0]], dtype=np.complex128)


def _const_spec_kwargs():
    """Single-buffer grid-invariant operands (perf review: v7x VMEM hygiene).

    Guarded so the script still runs on Pallas versions without pl.Buffered /
    pipeline_mode (falls back to the default double-buffering).
    """
    try:
        try:
            mode = pl.Buffered(1)
        except TypeError:
            mode = pl.Buffered(buffer_count=1)
        pl.BlockSpec((8, 128), lambda i: (0, 0), pipeline_mode=mode)
        return {"pipeline_mode": mode}
    except Exception:
        return {}


_CONST_SPEC_KWARGS = _const_spec_kwargs()


# ----------------------------------------------------------------------------
# In-kernel helpers
# ----------------------------------------------------------------------------
def _lin(a, x, b, y):
    """a*x + b*y with Python-constant a, b simplified for {0, +-1} (pure adds)."""
    def term(c, v):
        c = float(c)
        if c == 0.0:
            return None
        if c == 1.0:
            return v
        if c == -1.0:
            return -v
        return c * v

    t1 = term(a, x)
    t2 = term(b, y)
    if t1 is None and t2 is None:
        return jnp.zeros_like(x)
    if t1 is None:
        return t2
    if t2 is None:
        return t1
    return t1 + t2


def _butterfly(blocks, W):
    """Radix-N1 DFT across a list of complex (re, im) blocks (VPU adds only)."""
    n_out, n_in = W.shape
    out = []
    for k in range(n_out):
        rr, ii = None, None
        for n in range(n_in):
            c = W[k, n]
            xr, xi = blocks[n]
            tr = _lin(c.real, xr, -c.imag, xi)
            ti = _lin(c.imag, xr, c.real, xi)
            rr = tr if rr is None else rr + tr
            ii = ti if ii is None else ii + ti
        out.append((rr, ii))
    return out


def _cast3(xr, xi):
    b = jnp.bfloat16
    return xr.astype(b), xi.astype(b), (xr + xi).astype(b)


def _gauss_lmul(wr, wi, ws, xr, xi):
    """(wr + i wi) @ (xr + i xi), Gauss 3-multiply; bf16 MXU, f32 accumulation.

    ws = wr + wi is a host-precomputed constant (v5e review item)."""
    br, bi, bs = _cast3(xr, xi)
    k1 = jnp.dot(wr, br, preferred_element_type=jnp.float32)
    k2 = jnp.dot(wi, bi, preferred_element_type=jnp.float32)
    k3 = jnp.dot(ws, bs, preferred_element_type=jnp.float32)
    return k1 - k2, k3 - k1 - k2


def _gauss_rmul(xr, xi, wr, wi, ws):
    """(xr + i xi) @ (wr + i wi), Gauss 3-multiply; bf16 MXU, f32 accumulation."""
    br, bi, bs = _cast3(xr, xi)
    k1 = jnp.dot(br, wr, preferred_element_type=jnp.float32)
    k2 = jnp.dot(bi, wi, preferred_element_type=jnp.float32)
    k3 = jnp.dot(bs, ws, preferred_element_type=jnp.float32)
    return k1 - k2, k3 - k1 - k2


def _make_kernel(N1, S, W1f, W1i):
    """Build the per-image kernel body for a fixed split (N1 slabs of stride S)."""

    def kernel(er_ref, ei_ref, wr_ref, wi_ref, ws_ref, pr_ref, pi_ref,
               or_ref, oi_ref):
        f32 = jnp.float32
        rng = range(N1)

        def img_blk(ref, i, j):
            return ref[0, i * S:(i + 1) * S, j * S:(j + 1) * S].astype(f32)

        def phase_blk(ref, i, j):
            return ref[i * S:(i + 1) * S, j * S:(j + 1) * S].astype(f32)

        # Image as an N1 x N1 grid of (S, S) blocks (natural, slab-padded layout).
        X = [[(img_blk(er_ref, i, j), img_blk(ei_ref, i, j)) for j in rng]
             for i in rng]

        # ---- forward DFT over rows: butterflies, then per-slab matmul ----
        for j in rng:
            col = _butterfly([X[i][j] for i in rng], W1f)
            for i in rng:
                X[i][j] = col[i]
        X = [[_gauss_lmul(wr_ref[0, i], wi_ref[0, i], ws_ref[0, i], *X[i][j])
              for j in rng] for i in rng]

        # ---- forward DFT over columns ----
        for i in rng:
            X[i] = _butterfly(X[i], W1f)
        X = [[_gauss_rmul(*X[i][j], wr_ref[1, j], wi_ref[1, j], ws_ref[1, j])
              for j in rng] for i in rng]

        # ---- angular-spectrum phase (stored pre-permuted / pre-padded) ----
        for i in rng:
            for j in rng:
                pr = phase_blk(pr_ref, i, j)
                pim = phase_blk(pi_ref, i, j)
                vr, vi = X[i][j]
                X[i][j] = (vr * pr - vi * pim, vr * pim + vi * pr)

        # ---- inverse DFT over rows: per-slab matmul, then butterflies ----
        X = [[_gauss_lmul(wr_ref[2, i], wi_ref[2, i], ws_ref[2, i], *X[i][j])
              for j in rng] for i in rng]
        for j in rng:
            col = _butterfly([X[i][j] for i in rng], W1i)
            for i in rng:
                X[i][j] = col[i]

        # ---- inverse DFT over columns ----
        X = [[_gauss_rmul(*X[i][j], wr_ref[3, j], wi_ref[3, j], ws_ref[3, j])
              for j in rng] for i in rng]
        for i in rng:
            X[i] = _butterfly(X[i], W1i)

        # ---- store (bf16, lane-dense blocks) ----
        for i in rng:
            for j in rng:
                orr, oii = X[i][j]
                or_ref[0, i * S:(i + 1) * S, j * S:(j + 1) * S] = \
                    orr.astype(or_ref.dtype)
                oi_ref[0, i * S:(i + 1) * S, j * S:(j + 1) * S] = \
                    oii.astype(oi_ref.dtype)

    return kernel


# ----------------------------------------------------------------------------
# Host-side constant construction
# ----------------------------------------------------------------------------
def _build_constants(N, N1, N2, S, Np, phase_nat):
    """Per-slab DFT matrices (twiddles folded in) and the permuted phase."""
    n2 = np.arange(N2)
    W2 = np.exp(-2j * np.pi * np.outer(n2, n2) / N2)        # N2-point DFT
    G2 = np.exp(+2j * np.pi * np.outer(n2, n2) / N2) / N    # N2-point iDFT, 1/N folded
    k1v = np.arange(N1)
    tf = np.exp(-2j * np.pi * np.outer(k1v, n2) / N)         # forward twiddles
    ti = np.conj(tf)                                         # inverse twiddles

    fam = np.zeros((4, N1, S, S), dtype=np.complex128)
    for k1 in range(N1):
        m_f = W2 * tf[k1][None, :]        # W2 . diag(tf[k1])    (left-multiply)
        m_i = ti[k1][:, None] * G2        # diag(ti[k1]) . G2    (left-multiply)
        fam[0, k1, :N2, :N2] = m_f        # forward, row transform
        fam[1, k1, :N2, :N2] = m_f.T      # forward, column transform (right-mul)
        fam[2, k1, :N2, :N2] = m_i        # inverse, row transform
        fam[3, k1, :N2, :N2] = m_i.T      # inverse, column transform (right-mul)

    # Phase re-indexed into the kernel's permuted + slab-padded frequency layout:
    # padded index  k1*S + k2  <->  natural frequency  k2*N1 + k1.
    idx = -np.ones(Np, dtype=np.int64)
    for k1 in range(N1):
        idx[k1 * S: k1 * S + N2] = np.arange(N2) * N1 + k1
    valid = idx >= 0
    ph = np.zeros((Np, Np), dtype=np.complex128)
    ph[np.ix_(valid, valid)] = phase_nat[np.ix_(idx[valid], idx[valid])]
    return fam, ph


# ----------------------------------------------------------------------------
# Layer
# ----------------------------------------------------------------------------
class DiffractiveLayerPallas:
    """JAX/Pallas re-implementation of the PyTorch DiffractiveLayer forward."""

    def __init__(self, lam=5.32e-07, N_pixels=400, pixel_size=2e-05, dz=0.01,
                 radix=None):
        self.N = N_pixels

        # --- propagation phase, exactly as in the PyTorch __init__ (float64) ---
        fx = np.fft.fftshift(np.fft.fftfreq(N_pixels, d=pixel_size))
        fy = np.fft.fftshift(np.fft.fftfreq(N_pixels, d=pixel_size))
        fxx, fyy = np.meshgrid(fx, fy)
        argument = (2 * np.pi) ** 2 * ((1.0 / lam) ** 2 - fxx ** 2 - fyy ** 2)
        tmp = np.sqrt(np.abs(argument))
        kz = np.where(argument >= 0, tmp, 1j * tmp)
        phase = np.exp(1j * kz * dz)
        # fftshift(fft2(E)) * phase then ifftshift == fft2(E) * ifftshift(phase)
        phase_nat = np.fft.ifftshift(phase)
        self.phase_np = phase_nat            # natural DFT order (reference)

        # --- Cooley-Tukey split: N = N1 * N2, slab stride S = round_up(N2,128) ---
        if radix is None:
            N1, S, Np = _choose_split(N_pixels, _mxu_lane_granularity())
        else:
            assert radix in (1, 2, 4) and N_pixels % radix == 0
            N1 = radix
            S = _round_up(N_pixels // radix, 128)
            Np = N1 * S
        self.N1, self.N2, self.S, self.Np = N1, N_pixels // N1, S, Np
        self.W1f = _radix_dft(N1)
        self.W1i = np.conj(self.W1f)

        fam, ph = _build_constants(N_pixels, N1, self.N2, S, Np, phase_nat)
        self.Wr = jnp.asarray(fam.real, dtype=jnp.bfloat16)
        self.Wi = jnp.asarray(fam.imag, dtype=jnp.bfloat16)
        self.Ws = jnp.asarray(fam.real + fam.imag, dtype=jnp.bfloat16)  # Gauss sums
        self.Pr = jnp.asarray(ph.real, dtype=jnp.bfloat16)              # bf16 phase
        self.Pi = jnp.asarray(ph.imag, dtype=jnp.bfloat16)

        self._kernel = _make_kernel(N1, S, self.W1f, self.W1i)
        # One jit around pad/cast + kernel + crop/recombine so XLA fuses the glue.
        self._fwd = jax.jit(self._forward_impl)

    # ------------------------------------------------------------------
    def _forward_impl(self, E):
        B = E.shape[0]
        N, N1, N2, S, Np = self.N, self.N1, self.N2, self.S, self.Np

        # Slab-padded natural layout: row/col n = n1*N2 + n2 -> padded n1*S + n2.
        def pack(x):
            x = x.astype(jnp.float32).reshape(B, N1, N2, N1, N2)
            x = jnp.pad(x, ((0, 0), (0, 0), (0, S - N2), (0, 0), (0, S - N2)))
            return x.reshape(B, Np, Np).astype(jnp.bfloat16)

        def unpack(x):
            x = x.astype(jnp.float32).reshape(B, N1, S, N1, S)
            return x[:, :, :N2, :, :N2].reshape(B, N, N)

        er = pack(jnp.real(E))
        ei = pack(jnp.imag(E))

        img = pl.BlockSpec((1, Np, Np), lambda b: (b, 0, 0))
        wsp = pl.BlockSpec((4, N1, S, S), lambda b: (0, 0, 0, 0),
                           **_CONST_SPEC_KWARGS)
        psp = pl.BlockSpec((Np, Np), lambda b: (0, 0), **_CONST_SPEC_KWARGS)

        # 4 transforms x N1^2 blocks x Gauss-3 real (S,S,S) matmuls per image.
        flops = B * 4 * N1 * 3 * 2 * S * S * Np
        bytes_accessed = (B * Np * Np * 2 * (2 + 2)   # bf16 E in + bf16 out (re/im)
                          + 3 * 4 * N1 * S * S * 2    # stage matrices, fetched once
                          + 2 * Np * Np * 2)          # phase, fetched once
        cost = pl.CostEstimate(flops=flops, transcendentals=0,
                               bytes_accessed=bytes_accessed)

        out_r, out_i = pl.pallas_call(
            self._kernel,
            out_shape=(jax.ShapeDtypeStruct((B, Np, Np), jnp.bfloat16),
                       jax.ShapeDtypeStruct((B, Np, Np), jnp.bfloat16)),
            grid=(B,),
            in_specs=[img, img, wsp, wsp, wsp, psp, psp],
            out_specs=(img, img),
            compiler_params=pltpu.CompilerParams(
                dimension_semantics=("parallel",),
                # ~25 MiB resident; 40 MiB leaves headroom for the compiler's
                # f32 block temporaries while staying well under v7x's 64 MiB.
                vmem_limit_bytes=40 << 20),
            cost_estimate=cost,
        )(er, ei, self.Wr, self.Wi, self.Ws, self.Pr, self.Pi)

        return lax.complex(unpack(out_r), unpack(out_i))

    # ------------------------------------------------------------------
    def __call__(self, E):
        """E: complex array of shape (B, N, N). Returns complex64 (B, N, N)."""
        assert E.ndim == 3 and E.shape[1] == self.N and E.shape[2] == self.N
        return self._fwd(E)


# ----------------------------------------------------------------------------
# Smoke test
# ----------------------------------------------------------------------------
if __name__ == "__main__":
    def run_case(B, N, radix=None):
        layer = DiffractiveLayerPallas(N_pixels=N, radix=radix)
        key = jax.random.fold_in(jax.random.PRNGKey(0), N * 10 + (radix or 0))
        kr, ki = jax.random.split(key)
        E = (jax.random.normal(kr, (B, N, N), dtype=jnp.float32)
             + 1j * jax.random.normal(ki, (B, N, N), dtype=jnp.float32))

        out = jax.block_until_ready(layer(E))

        # Reference: same semantics as the PyTorch forward, in float64.
        E_np = np.asarray(E).astype(np.complex128)
        ref = np.fft.ifft2(np.fft.fft2(E_np) * layer.phase_np[None])
        err = (np.linalg.norm(np.asarray(out).astype(np.complex128) - ref)
               / np.linalg.norm(ref))
        assert err < 3e-2, f"N={N} radix={layer.N1}: relative error {err:.3e}"
        return err

    run_case(2, 16)             # small smoke shape (dense path, auto-selected)
    run_case(2, 400, radix=2)   # module default size, radix-2 CT (v6e/v7x choice)
    run_case(2, 400, radix=4)   # module default size, radix-4 CT (v5e choice)
    print("KERNEL_OK")
</pallas_src>

<mosaic_0001>
module attributes {stable_mosaic.version = 11 : i64} {
  func.func @kernel(%arg0: i32, %arg1: memref<1x128x128xbf16, #tpu.memory_space<vmem>>, %arg2: memref<1x128x128xbf16, #tpu.memory_space<vmem>>, %arg3: memref<4x1x128x128xbf16, #tpu.memory_space<vmem>>, %arg4: memref<4x1x128x128xbf16, #tpu.memory_space<vmem>>, %arg5: memref<4x1x128x128xbf16, #tpu.memory_space<vmem>>, %arg6: memref<128x128xbf16, #tpu.memory_space<vmem>>, %arg7: memref<128x128xbf16, #tpu.memory_space<vmem>>, %arg8: memref<1x128x128xbf16, #tpu.memory_space<vmem>>, %arg9: memref<1x128x128xbf16, #tpu.memory_space<vmem>>) attributes {dimension_semantics = [#tpu.dimension_semantics<parallel>], iteration_bounds = array<i64: 2>, scalar_prefetch = 0 : i64, scratch_operands = 0 : i64, tpu.core_type = #tpu.core_type<tc>, window_params = [{transform_indices = @transform_0, window_bounds = array<i64: 1, 128, 128>}, {transform_indices = @transform_1, window_bounds = array<i64: 1, 128, 128>}, {pipeline_mode = #tpu.pipeline_mode<synchronous>, transform_indices = @transform_2, window_bounds = array<i64: 4, 1, 128, 128>}, {pipeline_mode = #tpu.pipeline_mode<synchronous>, transform_indices = @transform_3, window_bounds = array<i64: 4, 1, 128, 128>}, {pipeline_mode = #tpu.pipeline_mode<synchronous>, transform_indices = @transform_4, window_bounds = array<i64: 4, 1, 128, 128>}, {pipeline_mode = #tpu.pipeline_mode<synchronous>, transform_indices = @transform_5, window_bounds = array<i64: 128, 128>}, {pipeline_mode = #tpu.pipeline_mode<synchronous>, transform_indices = @transform_6, window_bounds = array<i64: 128, 128>}, {transform_indices = @transform_7, window_bounds = array<i64: 1, 128, 128>}, {transform_indices = @transform_8, window_bounds = array<i64: 1, 128, 128>}]} {
    %c0 = arith.constant 0 : index
    %c0_0 = arith.constant 0 : index
    %c0_1 = arith.constant 0 : index
    %0 = vector.load %arg1[%c0, %c0_0, %c0_1] : memref<1x128x128xbf16, #tpu.memory_space<vmem>>, vector<1x128x128xbf16>
    %1 = vector.shape_cast %0 : vector<1x128x128xbf16> to vector<128x128xbf16>
    %2 = arith.extf %1 : vector<128x128xbf16> to vector<128x128xf32>
    %c0_2 = arith.constant 0 : index
    %c0_3 = arith.constant 0 : index
    %c0_4 = arith.constant 0 : index
    %3 = vector.load %arg2[%c0_2, %c0_3, %c0_4] : memref<1x128x128xbf16, #tpu.memory_space<vmem>>, vector<1x128x128xbf16>
    %4 = vector.shape_cast %3 : vector<1x128x128xbf16> to vector<128x128xbf16>
    %5 = arith.extf %4 : vector<128x128xbf16> to vector<128x128xf32>
    %c0_5 = arith.constant 0 : index
    %c0_6 = arith.constant 0 : index
    %c0_7 = arith.constant 0 : index
    %c0_8 = arith.constant 0 : index
    %6 = vector.load %arg3[%c0_5, %c0_6, %c0_7, %c0_8] : memref<4x1x128x128xbf16, #tpu.memory_space<vmem>>, vector<1x1x128x128xbf16>
    %7 = vector.shape_cast %6 : vector<1x1x128x128xbf16> to vector<128x128xbf16>
    %c0_9 = arith.constant 0 : index
    %c0_10 = arith.constant 0 : index
    %c0_11 = arith.constant 0 : index
    %c0_12 = arith.constant 0 : index
    %8 = vector.load %arg4[%c0_9, %c0_10, %c0_11, %c0_12] : memref<4x1x128x128xbf16, #tpu.memory_space<vmem>>, vector<1x1x128x128xbf16>
    %9 = vector.shape_cast %8 : vector<1x1x128x128xbf16> to vector<128x128xbf16>
    %c0_13 = arith.constant 0 : index
    %c0_14 = arith.constant 0 : index
    %c0_15 = arith.constant 0 : index
    %c0_16 = arith.constant 0 : index
    %10 = vector.load %arg5[%c0_13, %c0_14, %c0_15, %c0_16] : memref<4x1x128x128xbf16, #tpu.memory_space<vmem>>, vector<1x1x128x128xbf16>
    %11 = vector.shape_cast %10 : vector<1x1x128x128xbf16> to vector<128x128xbf16>
    %12 = arith.truncf %2 : vector<128x128xf32> to vector<128x128xbf16>
    %13 = arith.truncf %5 : vector<128x128xf32> to vector<128x128xbf16>
    %14 = arith.addf %2, %5 : vector<128x128xf32>
    %15 = arith.truncf %14 : vector<128x128xf32> to vector<128x128xbf16>
    %cst = arith.constant dense<0.000000e+00> : vector<128x128xf32>
    %16 = tpu.matmul %7, %12, %cst {dimension_numbers = #tpu.dot_dimension_numbers<[1], [0], [0], [1], [0, 0, 1, 1], [], []>} : vector<128x128xbf16>, vector<128x128xbf16>, vector<128x128xf32> -> vector<128x128xf32>
    %cst_17 = arith.constant dense<0.000000e+00> : vector<128x128xf32>
    %17 = tpu.matmul %9, %13, %cst_17 {dimension_numbers = #tpu.dot_dimension_numbers<[1], [0], [0], [1], [0, 0, 1, 1], [], []>} : vector<128x128xbf16>, vector<128x128xbf16>, vector<128x128xf32> -> vector<128x128xf32>
    %cst_18 = arith.constant dense<0.000000e+00> : vector<128x128xf32>
    %18 = tpu.matmul %11, %15, %cst_18 {dimension_numbers = #tpu.dot_dimension_numbers<[1], [0], [0], [1], [0, 0, 1, 1], [], []>} : vector<128x128xbf16>, vector<128x128xbf16>, vector<128x128xf32> -> vector<128x128xf32>
    %19 = arith.subf %16, %17 : vector<128x128xf32>
    %20 = arith.subf %18, %16 : vector<128x128xf32>
    %21 = arith.subf %20, %17 : vector<128x128xf32>
    %c1 = arith.constant 1 : index
    %c0_19 = arith.constant 0 : index
    %c0_20 = arith.constant 0 : index
    %c0_21 = arith.constant 0 : index
    %22 = vector.load %arg3[%c1, %c0_19, %c0_20, %c0_21] : memref<4x1x128x128xbf16, #tpu.memory_space<vmem>>, vector<1x1x128x128xbf16>
    %23 = vector.shape_cast %22 : vector<1x1x128x128xbf16> to vector<128x128xbf16>
    %c1_22 = arith.constant 1 : index
    %c0_23 = arith.constant 0 : index
    %c0_24 = arith.constant 0 : index
    %c0_25 = arith.constant 0 : index
    %24 = vector.load %arg4[%c1_22, %c0_23, %c0_24, %c0_25] : memref<4x1x128x128xbf16, #tpu.memory_space<vmem>>, vector<1x1x128x128xbf16>
    %25 = vector.shape_cast %24 : vector<1x1x128x128xbf16> to vector<128x128xbf16>
    %c1_26 = arith.constant 1 : index
    %c0_27 = arith.constant 0 : index
    %c0_28 = arith.constant 0 : index
    %c0_29 = arith.constant 0 : index
    %26 = vector.load %arg5[%c1_26, %c0_27, %c0_28, %c0_29] : memref<4x1x128x128xbf16, #tpu.memory_space<vmem>>, vector<1x1x128x128xbf16>
    %27 = vector.shape_cast %26 : vector<1x1x128x128xbf16> to vector<128x128xbf16>
    %28 = arith.truncf %19 : vector<128x128xf32> to vector<128x128xbf16>
    %29 = arith.truncf %21 : vector<128x128xf32> to vector<128x128xbf16>
    %30 = arith.addf %19, %21 : vector<128x128xf32>
    %31 = arith.truncf %30 : vector<128x128xf32> to vector<128x128xbf16>
    %cst_30 = arith.constant dense<0.000000e+00> : vector<128x128xf32>
    %32 = tpu.matmul %28, %23, %cst_30 {dimension_numbers = #tpu.dot_dimension_numbers<[1], [0], [0], [1], [0, 0, 1, 1], [], []>} : vector<128x128xbf16>, vector<128x128xbf16>, vector<128x128xf32> -> vector<128x128xf32>
    %cst_31 = arith.constant dense<0.000000e+00> : vector<128x128xf32>
    %33 = tpu.matmul %29, %25, %cst_31 {dimension_numbers = #tpu.dot_dimension_numbers<[1], [0], [0], [1], [0, 0, 1, 1], [], []>} : vector<128x128xbf16>, vector<128x128xbf16>, vector<128x128xf32> -> vector<128x128xf32>
    %cst_32 = arith.constant dense<0.000000e+00> : vector<128x128xf32>
    %34 = tpu.matmul %31, %27, %cst_32 {dimension_numbers = #tpu.dot_dimension_numbers<[1], [0], [0], [1], [0, 0, 1, 1], [], []>} : vector<128x128xbf16>, vector<128x128xbf16>, vector<128x128xf32> -> vector<128x128xf32>
    %35 = arith.subf %32, %33 : vector<128x128xf32>
    %36 = arith.subf %34, %32 : vector<128x128xf32>
    %37 = arith.subf %36, %33 : vector<128x128xf32>
    %c0_33 = arith.constant 0 : index
    %c0_34 = arith.constant 0 : index
    %38 = vector.load %arg6[%c0_33, %c0_34] : memref<128x128xbf16, #tpu.memory_space<vmem>>, vector<128x128xbf16>
    %39 = arith.extf %38 : vector<128x128xbf16> to vector<128x128xf32>
    %c0_35 = arith.constant 0 : index
    %c0_36 = arith.constant 0 : index
    %40 = vector.load %arg7[%c0_35, %c0_36] : memref<128x128xbf16, #tpu.memory_space<vmem>>, vector<128x128xbf16>
    %41 = arith.extf %40 : vector<128x128xbf16> to vector<128x128xf32>
    %42 = arith.mulf %35, %39 : vector<128x128xf32>
    %43 = arith.mulf %37, %41 : vector<128x128xf32>
    %44 = arith.subf %42, %43 : vector<128x128xf32>
    %45 = arith.mulf %35, %41 : vector<128x128xf32>
    %46 = arith.mulf %37, %39 : vector<128x128xf32>
    %47 = arith.addf %45, %46 : vector<128x128xf32>
    %c2 = arith.constant 2 : index
    %c0_37 = arith.constant 0 : index
    %c0_38 = arith.constant 0 : index
    %c0_39 = arith.constant 0 : index
    %48 = vector.load %arg3[%c2, %c0_37, %c0_38, %c0_39] : memref<4x1x128x128xbf16, #tpu.memory_space<vmem>>, vector<1x1x128x128xbf16>
    %49 = vector.shape_cast %48 : vector<1x1x128x128xbf16> to vector<128x128xbf16>
    %c2_40 = arith.constant 2 : index
    %c0_41 = arith.constant 0 : index
    %c0_42 = arith.constant 0 : index
    %c0_43 = arith.constant 0 : index
    %50 = vector.load %arg4[%c2_40, %c0_41, %c0_42, %c0_43] : memref<4x1x128x128xbf16, #tpu.memory_space<vmem>>, vector<1x1x128x128xbf16>
    %51 = vector.shape_cast %50 : vector<1x1x128x128xbf16> to vector<128x128xbf16>
    %c2_44 = arith.constant 2 : index
    %c0_45 = arith.constant 0 : index
    %c0_46 = arith.constant 0 : index
    %c0_47 = arith.constant 0 : index
    %52 = vector.load %arg5[%c2_44, %c0_45, %c0_46, %c0_47] : memref<4x1x128x128xbf16, #tpu.memory_space<vmem>>, vector<1x1x128x128xbf16>
    %53 = vector.shape_cast %52 : vector<1x1x128x128xbf16> to vector<128x128xbf16>
    %54 = arith.truncf %44 : vector<128x128xf32> to vector<128x128xbf16>
    %55 = arith.truncf %47 : vector<128x128xf32> to vector<128x128xbf16>
    %56 = arith.addf %44, %47 : vector<128x128xf32>
    %57 = arith.truncf %56 : vector<128x128xf32> to vector<128x128xbf16>
    %cst_48 = arith.constant dense<0.000000e+00> : vector<128x128xf32>
    %58 = tpu.matmul %49, %54, %cst_48 {dimension_numbers = #tpu.dot_dimension_numbers<[1], [0], [0], [1], [0, 0, 1, 1], [], []>} : vector<128x128xbf16>, vector<128x128xbf16>, vector<128x128xf32> -> vector<128x128xf32>
    %cst_49 = arith.constant dense<0.000000e+00> : vector<128x128xf32>
    %59 = tpu.matmul %51, %55, %cst_49 {dimension_numbers = #tpu.dot_dimension_numbers<[1], [0], [0], [1], [0, 0, 1, 1], [], []>} : vector<128x128xbf16>, vector<128x128xbf16>, vector<128x128xf32> -> vector<128x128xf32>
    %cst_50 = arith.constant dense<0.000000e+00> : vector<128x128xf32>
    %60 = tpu.matmul %53, %57, %cst_50 {dimension_numbers = #tpu.dot_dimension_numbers<[1], [0], [0], [1], [0, 0, 1, 1], [], []>} : vector<128x128xbf16>, vector<128x128xbf16>, vector<128x128xf32> -> vector<128x128xf32>
    %61 = arith.subf %58, %59 : vector<128x128xf32>
    %62 = arith.subf %60, %58 : vector<128x128xf32>
    %63 = arith.subf %62, %59 : vector<128x128xf32>
    %c3 = arith.constant 3 : index
    %c0_51 = arith.constant 0 : index
    %c0_52 = arith.constant 0 : index
    %c0_53 = arith.constant 0 : index
    %64 = vector.load %arg3[%c3, %c0_51, %c0_52, %c0_53] : memref<4x1x128x128xbf16, #tpu.memory_space<vmem>>, vector<1x1x128x128xbf16>
    %65 = vector.shape_cast %64 : vector<1x1x128x128xbf16> to vector<128x128xbf16>
    %c3_54 = arith.constant 3 : index
    %c0_55 = arith.constant 0 : index
    %c0_56 = arith.constant 0 : index
    %c0_57 = arith.constant 0 : index
    %66 = vector.load %arg4[%c3_54, %c0_55, %c0_56, %c0_57] : memref<4x1x128x128xbf16, #tpu.memory_space<vmem>>, vector<1x1x128x128xbf16>
    %67 = vector.shape_cast %66 : vector<1x1x128x128xbf16> to vector<128x128xbf16>
    %c3_58 = arith.constant 3 : index
    %c0_59 = arith.constant 0 : index
    %c0_60 = arith.constant 0 : index
    %c0_61 = arith.constant 0 : index
    %68 = vector.load %arg5[%c3_58, %c0_59, %c0_60, %c0_61] : memref<4x1x128x128xbf16, #tpu.memory_space<vmem>>, vector<1x1x128x128xbf16>
    %69 = vector.shape_cast %68 : vector<1x1x128x128xbf16> to vector<128x128xbf16>
    %70 = arith.truncf %61 : vector<128x128xf32> to vector<128x128xbf16>
    %71 = arith.truncf %63 : vector<128x128xf32> to vector<128x128xbf16>
    %72 = arith.addf %61, %63 : vector<128x128xf32>
    %73 = arith.truncf %72 : vector<128x128xf32> to vector<128x128xbf16>
    %cst_62 = arith.constant dense<0.000000e+00> : vector<128x128xf32>
    %74 = tpu.matmul %70, %65, %cst_62 {dimension_numbers = #tpu.dot_dimension_numbers<[1], [0], [0], [1], [0, 0, 1, 1], [], []>} : vector<128x128xbf16>, vector<128x128xbf16>, vector<128x128xf32> -> vector<128x128xf32>
    %cst_63 = arith.constant dense<0.000000e+00> : vector<128x128xf32>
    %75 = tpu.matmul %71, %67, %cst_63 {dimension_numbers = #tpu.dot_dimension_numbers<[1], [0], [0], [1], [0, 0, 1, 1], [], []>} : vector<128x128xbf16>, vector<128x128xbf16>, vector<128x128xf32> -> vector<128x128xf32>
    %cst_64 = arith.constant dense<0.000000e+00> : vector<128x128xf32>
    %76 = tpu.matmul %73, %69, %cst_64 {dimension_numbers = #tpu.dot_dimension_numbers<[1], [0], [0], [1], [0, 0, 1, 1], [], []>} : vector<128x128xbf16>, vector<128x128xbf16>, vector<128x128xf32> -> vector<128x128xf32>
    %77 = arith.subf %74, %75 : vector<128x128xf32>
    %78 = arith.subf %76, %74 : vector<128x128xf32>
    %79 = arith.subf %78, %75 : vector<128x128xf32>
    %80 = arith.truncf %77 : vector<128x128xf32> to vector<128x128xbf16>
    %c0_65 = arith.constant 0 : index
    %c0_66 = arith.constant 0 : index
    %c0_67 = arith.constant 0 : index
    %81 = vector.load %arg8[%c0_65, %c0_66, %c0_67] : memref<1x128x128xbf16, #tpu.memory_space<vmem>>, vector<1x128x128xbf16>
    %82 = vector.shape_cast %81 : vector<1x128x128xbf16> to vector<128x128xbf16>
    %83 = vector.shape_cast %80 : vector<128x128xbf16> to vector<1x128x128xbf16>
    tpu.vector_store %arg8[%c0_65, %c0_66, %c0_67], %83 {strides = array<i32>} : memref<1x128x128xbf16, #tpu.memory_space<vmem>>, vector<1x128x128xbf16>,
    %84 = arith.truncf %79 : vector<128x128xf32> to vector<128x128xbf16>
    %c0_68 = arith.constant 0 : index
    %c0_69 = arith.constant 0 : index
    %c0_70 = arith.constant 0 : index
    %85 = vector.load %arg9[%c0_68, %c0_69, %c0_70] : memref<1x128x128xbf16, #tpu.memory_space<vmem>>, vector<1x128x128xbf16>
    %86 = vector.shape_cast %85 : vector<1x128x128xbf16> to vector<128x128xbf16>
    %87 = vector.shape_cast %84 : vector<128x128xbf16> to vector<1x128x128xbf16>
    tpu.vector_store %arg9[%c0_68, %c0_69, %c0_70], %87 {strides = array<i32>} : memref<1x128x128xbf16, #tpu.memory_space<vmem>>, vector<1x128x128xbf16>,
    return
  }
  func.func @transform_0(%arg0: i32) -> (i32, i32, i32) {
    %c0_i32 = arith.constant 0 : i32
    %c0_i32_0 = arith.constant 0 : i32
    %c0_i32_1 = arith.constant 0 : i32
    return %arg0, %c0_i32, %c0_i32_0 : i32, i32, i32
  }
  func.func @transform_1(%arg0: i32) -> (i32, i32, i32) {
    %c0_i32 = arith.constant 0 : i32
    %c0_i32_0 = arith.constant 0 : i32
    %c0_i32_1 = arith.constant 0 : i32
    return %arg0, %c0_i32, %c0_i32_0 : i32, i32, i32
  }
  func.func @transform_2(%arg0: i32) -> (i32, i32, i32, i32) {
    %c0_i32 = arith.constant 0 : i32
    %c0_i32_0 = arith.constant 0 : i32
    %c0_i32_1 = arith.constant 0 : i32
    %c0_i32_2 = arith.constant 0 : i32
    %c0_i32_3 = arith.constant 0 : i32
    return %c0_i32, %c0_i32_0, %c0_i32_1, %c0_i32_2 : i32, i32, i32, i32
  }
  func.func @transform_3(%arg0: i32) -> (i32, i32, i32, i32) {
    %c0_i32 = arith.constant 0 : i32
    %c0_i32_0 = arith.constant 0 : i32
    %c0_i32_1 = arith.constant 0 : i32
    %c0_i32_2 = arith.constant 0 : i32
    %c0_i32_3 = arith.constant 0 : i32
    return %c0_i32, %c0_i32_0, %c0_i32_1, %c0_i32_2 : i32, i32, i32, i32
  }
  func.func @transform_4(%arg0: i32) -> (i32, i32, i32, i32) {
    %c0_i32 = arith.constant 0 : i32
    %c0_i32_0 = arith.constant 0 : i32
    %c0_i32_1 = arith.constant 0 : i32
    %c0_i32_2 = arith.constant 0 : i32
    %c0_i32_3 = arith.constant 0 : i32
    return %c0_i32, %c0_i32_0, %c0_i32_1, %c0_i32_2 : i32, i32, i32, i32
  }
  func.func @transform_5(%arg0: i32) -> (i32, i32) {
    %c0_i32 = arith.constant 0 : i32
    %c0_i32_0 = arith.constant 0 : i32
    %c0_i32_1 = arith.constant 0 : i32
    return %c0_i32, %c0_i32_0 : i32, i32
  }
  func.func @transform_6(%arg0: i32) -> (i32, i32) {
    %c0_i32 = arith.constant 0 : i32
    %c0_i32_0 = arith.constant 0 : i32
    %c0_i32_1 = arith.constant 0 : i32
    return %c0_i32, %c0_i32_0 : i32, i32
  }
  func.func @transform_7(%arg0: i32) -> (i32, i32, i32) {
    %c0_i32 = arith.constant 0 : i32
    %c0_i32_0 = arith.constant 0 : i32
    %c0_i32_1 = arith.constant 0 : i32
    return %arg0, %c0_i32, %c0_i32_0 : i32, i32, i32
  }
  func.func @transform_8(%arg0: i32) -> (i32, i32, i32) {
    %c0_i32 = arith.constant 0 : i32
    %c0_i32_0 = arith.constant 0 : i32
    %c0_i32_1 = arith.constant 0 : i32
    return %arg0, %c0_i32, %c0_i32_0 : i32, i32, i32
  }
}

</mosaic_0001>

<bundles_post_ra>
// kernel: custom-call
= control target key start
LH: loop header
LB: loop body
LE: loop exit
PB: predicated region body
PF: predicated region fallthrough
CT: control target
= control target key end

     0   :  { %2 = vsyncpa [#allocation0], 0  ;;  %s47_s0 = inlined_call_operand.hbm [shape: c64[2,16,16], index: 0, kind: input, shape index: {}]   ;;  %s48_s1 = inlined_call_operand.vmem [shape: f32[2,16,16], index: 1, kind: output, shape index: {}]  }
   0x1   :  { %s3_s8 = sshll.u32 %s48_s1, 4  ;;  %s4_s8 = int_to_ptr.vmem [resolvable:$true] %s3_s8 }
   0x2   :  { %s17_s9 = scalar_lea.vmem %s4_s8, 512  ;;  %p22_p1 = scmp.lt.s32.totalorder %s4_s8, %s4_s8 }
   0x3   :  { %p18_p0 = scmp.ne.s32.totalorder %s4_s8, %s17_s9  ;;  %p23_p2 = scmp.lt.s32.totalorder %s17_s9, %s17_s9 }
   0x5   :  { %p24_p3 = por %p23_p2, %p22_p1 }
   0x7   :  { %p25_p4 = pnand %p24_p3, %p18_p0 }
   0x9   :  { %28 = shalt.err (!%p25_p4)  }
   0xa   :  { %6 = dma.hbm_to_vmem [thread:$0]  %s47_s0, 512, %s4_s8, [#allocation0] }
   0xb   :  { %29 = dma.done.wait [#allocation0], 512  }
   0xc   :  { %30 = vsyncadd [#allocation0], 4294966784 }
   0xd   :  { %8 = vsyncpa [#allocation0], 1 }

// kernel: custom-call.1
= control target key start
LH: loop header
LB: loop body
LE: loop exit
PB: predicated region body
PF: predicated region fallthrough
CT: control target
= control target key end

     0   :  { %s51_s0 = inlined_call_operand.hbm [shape: c64[2,16,16], index: 0, kind: input, shape index: {}]   ;;  %s52_s1 = inlined_call_operand.vmem [shape: f32[2,16,16], index: 1, kind: output, shape index: {}]  }
   0x1   :  { %s2_s8 = scalar_lea.hbm %s51_s0, 512 }
   0x2   :  { %3 = vsyncpa [#allocation0], 0  ;;  %s4_s11 = sshll.u32 %s52_s1, 4  ;;  %s5_s11 = int_to_ptr.vmem [resolvable:$true] %s4_s11 }
   0x3   :  { %s20_s12 = scalar_lea.vmem %s5_s11, 512  ;;  %p25_p1 = scmp.lt.s32.totalorder %s5_s11, %s5_s11 }
   0x4   :  { %p21_p0 = scmp.ne.s32.totalorder %s5_s11, %s20_s12  ;;  %p26_p2 = scmp.lt.s32.totalorder %s20_s12, %s20_s12 }
   0x6   :  { %p27_p3 = por %p26_p2, %p25_p1 }
   0x8   :  { %p28_p4 = pnand %p27_p3, %p21_p0 }
   0xa   :  { %31 = shalt.err (!%p28_p4)  }
   0xb   :  { %7 = dma.hbm_to_vmem [thread:$0]  %s2_s8, 512, %s5_s11, [#allocation0] }
   0xc   :  { %33 = dma.done.wait [#allocation0], 512  }
   0xd   :  { %34 = vsyncadd [#allocation0], 4294966784 }
   0xe   :  { %9 = vsyncpa [#allocation0], 1 }

// kernel: custom-call.2
= control target key start
LH: loop header
LB: loop body
LE: loop exit
PB: predicated region body
PF: predicated region fallthrough
CT: control target
= control target key end

     0   :  { %s92_s0 = inlined_call_operand.vmem [shape: f32[2,16,16], index: 0, kind: input, shape index: {}]   ;;  %s93_s1 = inlined_call_operand.vmem [shape: f32[2,16,16], index: 1, kind: input, shape index: {}]   ;;  %s94_s2 = inlined_call_operand.hbm [shape: c64[2,16,16], index: 2, kind: output, shape index: {}]  }
   0x1   :  { %s3_s11 = scalar_lea.hbm %s94_s2, 512 }
   0x2   :  { %4 = vsyncpa [#allocation0], 0  ;;  %s5_s14 = sshll.u32 %s92_s0, 4  ;;  %s6_s14 = int_to_ptr.vmem [resolvable:$true] %s5_s14 }
   0x3   :  { %s18_s15 = scalar_lea.vmem %s6_s14, 512  ;;  %p23_p1 = scmp.lt.s32.totalorder %s6_s14, %s6_s14 }
   0x4   :  { %p19_p0 = scmp.ne.s32.totalorder %s6_s14, %s18_s15  ;;  %p24_p2 = scmp.lt.s32.totalorder %s18_s15, %s18_s15 }
   0x6   :  { %p25_p3 = por %p24_p2, %p23_p1 }
   0x8   :  { %p26_p4 = pnand %p25_p3, %p19_p0 }
   0xa   :  { %29 = shalt.err (!%p26_p4)  }
   0xb   :  { %8 = dma.vmem_to_hbm [thread:$0]  %s6_s14, 512, %s94_s2, [#allocation0] }
   0xc   :  { %61 = dma.done.wait [#allocation0], 512  }
   0xd   :  { %62 = vsyncadd [#allocation0], 4294966784 }
   0xe   :  { %10 = vsyncpa [#allocation0], 1 }
   0xf   :  { %11 = vsyncpa [#allocation1], 0  ;;  %s12_s0 = sshll.u32 %s93_s1, 4  ;;  %s13_s0 = int_to_ptr.vmem [resolvable:$true] %s12_s0 }
  0x10   :  { %s38_s20 = scalar_lea.vmem %s13_s0, 512  ;;  %p43_p6 = scmp.lt.s32.totalorder %s13_s0, %s13_s0 }
  0x11   :  { %p39_p5 = scmp.ne.s32.totalorder %s13_s0, %s38_s20  ;;  %p44_p7 = scmp.lt.s32.totalorder %s38_s20, %s38_s20 }
  0x13   :  { %p45_p8 = por %p44_p7, %p43_p6 }
  0x15   :  { %p46_p9 = pnand %p45_p8, %p39_p5 }
  0x17   :  { %49 = shalt.err (!%p46_p9)  }
  0x18   :  { %15 = dma.vmem_to_hbm [thread:$0]  %s13_s0, 512, %s3_s11, [#allocation1] }
  0x19   :  { %63 = dma.done.wait [#allocation1], 512  }
  0x1a   :  { %64 = vsyncadd [#allocation1], 4294966784 }
  0x1b   :  { %17 = vsyncpa [#allocation1], 1 }

// kernel: _forward_impl.1
= control target key start
LH: loop header
LB: loop body
LE: loop exit
PB: predicated region body
PF: predicated region fallthrough
CT: control target
= control target key end

     0   :  { %14 = vsyncpa [#allocation3], 0  ;;  %s5728_s0 = inlined_call_operand.vmem [shape: bf16[2,128,128], index: 0, kind: input, shape index: {}]   ;;  %s5729_s1 = inlined_call_operand.vmem [shape: bf16[2,128,128], index: 1, kind: input, shape index: {}]   ;;  %s5730_s2 = inlined_call_operand.hbm [shape: bf16[4,1,128,128], index: 2, kind: input, shape index: {}]   ;;  %s5731_s3 = inlined_call_operand.hbm [shape: bf16[4,1,128,128], index: 3, kind: input, shape index: {}]   ;;  %s5732_s4 = inlined_call_operand.vmem [shape: bf16[4,1,128,128], index: 4, kind: input, shape index: {}]   ;;  %s5733_s5 = inlined_call_operand.vmem [shape: bf16[128,128], index: 5, kind: input, shape index: {}]   ;;  %s5734_s6 = inlined_call_operand.vmem [shape: bf16[128,128], index: 6, kind: input, shape index: {}]   ;;  %s5735_s7 = inlined_call_operand.vmem [shape: bf16[2,128,128], index: 7, kind: output, shape index: {0}]   ;;  %s5736_s8 = inlined_call_operand.vmem [shape: bf16[2,128,128], index: 8, kind: output, shape index: {1}]  }
   0x1   :  { %15 = vsyncpa [#allocation5], 0  ;;  %s4520_s27 = smov 0  }
   0x2 LB: > { %s4526_s28 = sadd.s32 4294967295, %s4469_s27   ;;  %p3251_p0 = scmp.ge.s32.totalorder %s4469_s27, 1  ;;  %s4469_s27 = sphi %s4520_s27, %s21_s27  }
   0x3   : > { %p235_p1 = scmp.lt.s32.totalorder %s4469_s27, 3  ;;  %s4471_s29 = smov [#allocation2]  }
   0x4   : > { %s247_s30 = sshll.u32 %s4471_s29, 4  ;;  %p4259_p3 = scmp.eq.s32.totalorder %s4526_s28, 0  ;;  %s248_s30 = int_to_ptr.vmem [resolvable:$true] %s247_s30 }
   0x5   : > { %p4530_p2 = pnand %p3251_p0, %p235_p1  ;;  %s4472_s10 = smov [#allocation4]  }
   0x6   : > { %s260_s11 = sshll.u32 %s4472_s10, 4  ;;  %s4414_s13 = scalar_lea.vmem %s248_s30, 4096  ;;  %s261_s11 = int_to_ptr.vmem [resolvable:$true] %s260_s11 }
   0x7   : > { %p4252_p4 = pneg %p4530_p2  ;;  %p4415_p7 = scmp.ne.s32.totalorder %s248_s30, %s4414_s13 }
   0x8   : > { %p4422_p10 = scmp.lt.s32.totalorder %s248_s30, %s248_s30  ;;  %p4423_p11 = scmp.lt.s32.totalorder %s4414_s13, %s4414_s13 }
   0x9   : > { %p4539_p5 = pnand %p4259_p3, %p4252_p4 }
   0xa   : > { %p4424_p12 = por %p4423_p11, %p4422_p10 }
   0xb   : > { %p4405_p6 = pneg %p4539_p5 }
   0xd   : > { %p4417_p8 = pnand %p4415_p7, %p4405_p6 }
   0xf   : > { %p4418_p9 = pneg %p4417_p8 }
  0x11   : > { %p4425_p13 = pnand %p4424_p12, %p4418_p9 }
  0x13   : > { %4428 = shalt.err (!%p4425_p13)
}
  0x14   : > { %s4473_s14 = smov 64   ;;  %s4474_s15 = smov 4  }
  0x15   : > { %4255 = dma.hbm_to_vmem [thread:$0]  (!%p4539_p5), %s5730_s2, 4096, %s248_s30, [#allocation3], %s4473_s14, %s4473_s14, %s4474_s15  }
  0x16   : > { %s4440_s18 = scalar_lea.vmem %s261_s11, 4096  ;;  %p4448_p7 = scmp.lt.s32.totalorder %s261_s11, %s261_s11 }
  0x17   : > { %p4441_p0 = scmp.ne.s32.totalorder %s261_s11, %s4440_s18  ;;  %p4449_p8 = scmp.lt.s32.totalorder %s4440_s18, %s4440_s18 }
  0x19   : > { %p4443_p1 = pnand %p4441_p0, %p4405_p6  ;;  %p4450_p10 = por %p4449_p8, %p4448_p7 }
  0x1b   : > { %p4444_p4 = pneg %p4443_p1 }
  0x1d   : > { %p4451_p9 = pnand %p4450_p10, %p4444_p4 }
  0x1f   : > { %4454 = shalt.err (!%p4451_p9)
}
  0x20   : > { %4258 = dma.hbm_to_vmem [thread:$0]  (!%p4539_p5), %s5731_s3, 4096, %s261_s11, [#allocation5], %s4473_s14, %s4473_s14, %s4474_s15  }
  0x21   : > { %301 = sbr.rel (%p4530_p2) target bundleno = 1061 (0x425), region = 48 }
  0x26   : > { %4460 = dma.done.wait (%p4259_p3), [#allocation3], 4096  }
  0x27   : > { %4462 = vsyncadd (%p4259_p3), [#allocation3], 4294963200 }
  0x28   : > { %4464 = dma.done.wait (%p4259_p3), [#allocation5], 4096  }
  0x29   : > { %4466 = vsyncadd (%p4259_p3), [#allocation5], 4294963200  ;;  %p349_p6 = scmp.lt.s32.totalorder %s4526_s28, 1  ;;  %v4291_v8 = vld [vmem:[#allocation2] sm:$0xff]   ;;  %v4293_v32 = vld [vmem:[#allocation2 + $0x8] sm:$0xff]  }
  0x2a   : > { %v4292_v9 = vld [vmem:[#allocation4] sm:$0xff]   ;;  %3876 = vmatprep.mubr.bf16.mxu0 %v4291_v8  ;;  %v4315_v36 = vld [vmem:[#allocation2 + $0x78] sm:$0xff]   ;;  %v4294_v37 = vld [vmem:[#allocation4 + $0x8] sm:$0xff]  }
  0x2b   : > { %s5812_s28 = smov (!%p349_p6, %s4526_s28), 1  ;;  %3908 = vmatprep.mubr.bf16.mxu1 %v4292_v9  ;;  %v4295_v41 = vld [vmem:[#allocation2 + $0x10] sm:$0xff]   ;;  %v4297_v52 = vld [vmem:[#allocation2 + $0x18] sm:$0xff]   ;;  %v4317_v56 = vld [vmem:[#allocation2 + $0x68] sm:$0xff]  }
  0x2c   : > { %s4573_s21 = sshll.u32 %s5812_s28, 6  ;;  %v4296_v44 = vld [vmem:[#allocation4 + $0x10] sm:$0xff]   ;;  %v4298_v57 = vld [vmem:[#allocation4 + $0x18] sm:$0xff]   ;;  %v4299_v58 = vld [vmem:[#allocation2 + $0x20] sm:$0xff]  }
  0x2d   : > { %s4579_s24 = scalar_lea.vmem %s5728_s0, %s4573_s21  ;;  %s4585_s29 = scalar_lea.vmem %s5729_s1, %s4573_s21  ;;  %v4316_v47 = vld [vmem:[#allocation2 + $0x70] sm:$0xff]   ;;  %v4300_v62 = vld [vmem:[#allocation4 + $0x20] sm:$0xff]   ;;  %v4301_v8 = vld [vmem:[#allocation2 + $0x28] sm:$0xff]  }
  0x2e   : > { %v384_v0 = vld [vmem:[%s4579_s24 + $0x38] sm:$0xff]   ;;  %v4590_v2 = vld [vmem:[%s4579_s24 + $0x30] sm:$0xff]   ;;  %v4596_v4 = vld [vmem:[%s4579_s24 + $0x28] sm:$0xff]   ;;  %s5681_s26 = scalar_lea.vmem %s5735_s7, %s4573_s21  ;;  %s5688_s30 = scalar_lea.vmem %s5736_s8, %s4573_s21 }
  0x2f   : > { %v416_v1 = vld [vmem:[%s4585_s29 + $0x38] sm:$0xff]   ;;  %v4593_v3 = vld [vmem:[%s4585_s29 + $0x30] sm:$0xff]   ;;  %3860 = vmatprep.subr.bf16.mxu0 %v384_v0  ;;  %v4599_v5 = vld [vmem:[%s4585_s29 + $0x28] sm:$0xff]   ;;  %v400_v16 = vunpack.c.l.bf16 %v384_v0  ;;  %v401_v18 = vunpack.c.h.bf16 %v384_v0  ;;  %v398_v23 = vunpack.c.l.bf16 %v4590_v2  ;;  %v399_v24 = vunpack.c.h.bf16 %v4590_v2 }
  0x30   : > { %3892 = vmatprep.subr.bf16.mxu1 %v416_v1  ;;  %3861 = vmatpush3.bf16.msra.mxu0 %v384_v0  ;;  %v4602_v6 = vld [vmem:[%s4579_s24 + $0x20] sm:$0xff]   ;;  %v4614_v10 = vld [vmem:[%s4579_s24 + $0x18] sm:$0xff]   ;;  %v4624_v12 = vld [vmem:[%s4579_s24 + $0x10] sm:$0xff]   ;;  %v432_v17 = vunpack.c.l.bf16 %v416_v1  ;;  %v433_v19 = vunpack.c.h.bf16 %v416_v1  ;;  %v430_v26 = vunpack.c.l.bf16 %v4593_v3  ;;  %v431_v27 = vunpack.c.h.bf16 %v4593_v3 }
  0x31   : > { %3893 = vmatpush3.bf16.msra.mxu1 %v416_v1  ;;  %3862 = vmatprep.subr.bf16.mxu0 %v4590_v2  ;;  %v4606_v7 = vld [vmem:[%s4585_s29 + $0x20] sm:$0xff]   ;;  %v4617_v11 = vld [vmem:[%s4585_s29 + $0x18] sm:$0xff]   ;;  %v4627_v13 = vld [vmem:[%s4585_s29 + $0x10] sm:$0xff]   ;;  %v396_v28 = vunpack.c.l.bf16 %v4596_v4  ;;  %v397_v29 = vunpack.c.h.bf16 %v4596_v4  ;;  %v428_v30 = vunpack.c.l.bf16 %v4599_v5  ;;  %v429_v31 = vunpack.c.h.bf16 %v4599_v5 }
  0x32   : > { %3894 = vmatprep.subr.bf16.mxu1 %v4593_v3  ;;  %v4634_v14 = vld [vmem:[%s4579_s24 + $0x8] sm:$0xff]   ;;  %v4644_v20 = vld [vmem:[%s4579_s24] sm:$0xff]   ;;  %v496_v22 = vadd.f32 %v432_v17, %v400_v16  ;;  %v497_v25 = vadd.f32 %v433_v19, %v401_v18  ;;  %v494_v34 = vadd.f32 %v430_v26, %v398_v23  ;;  %v495_v35 = vadd.f32 %v431_v27, %v399_v24  ;;  %v4303_v16 = vld [vmem:[#allocation2 + $0x30] sm:$0xff]  }
  0x33   : > { %v4637_v15 = vld [vmem:[%s4585_s29 + $0x8] sm:$0xff]   ;;  %v4647_v21 = vld [vmem:[%s4585_s29] sm:$0xff]   ;;  %v394_v38 = vunpack.c.l.bf16 %v4602_v6  ;;  %v395_v39 = vunpack.c.h.bf16 %v4602_v6  ;;  %v426_v40 = vunpack.c.l.bf16 %v4606_v7  ;;  %v427_v42 = vunpack.c.h.bf16 %v4606_v7 }
  0x34   : > { %3863 = vmatpush3.bf16.msra.mxu0 %v4590_v2  ;;  %v505_v33 = vpack.c.bf16 %v497_v25, %v496_v22  ;;  %v504_v43 = vpack.c.bf16 %v495_v35, %v494_v34  ;;  %v492_v45 = vadd.f32 %v428_v30, %v396_v28  ;;  %v493_v46 = vadd.f32 %v429_v31, %v397_v29  ;;  %v4305_v25 = vld [vmem:[#allocation2 + $0x38] sm:$0xff]   ;;  %v4308_v30 = vld [vmem:[%s5732_s4 + $0x8] sm:$0xff]   ;;  %v4309_v31 = vld [vmem:[%s5732_s4 + $0x10] sm:$0xff]  }
  0x35   : > { %3895 = vmatpush3.bf16.msra.mxu1 %v4593_v3  ;;  %3864 = vmatprep.subr.bf16.mxu0 %v4596_v4  ;;  %v392_v48 = vunpack.c.l.bf16 %v4614_v10  ;;  %v393_v49 = vunpack.c.h.bf16 %v4614_v10  ;;  %v424_v50 = vunpack.c.l.bf16 %v4617_v11  ;;  %v425_v51 = vunpack.c.h.bf16 %v4617_v11  ;;  %v4318_v3 = vld [vmem:[#allocation2 + $0x60] sm:$0xff]   ;;  %v4306_v28 = vld [vmem:[#allocation4 + $0x38] sm:$0xff]   ;;  %v4312_v34 = vld [vmem:[%s5732_s4 + $0x28] sm:$0xff]  }
  0x36   : > { %3896 = vmatprep.subr.bf16.mxu1 %v4599_v5  ;;  %v503_v53 = vpack.c.bf16 %v493_v46, %v492_v45  ;;  %v490_v54 = vadd.f32 %v426_v40, %v394_v38  ;;  %v491_v55 = vadd.f32 %v427_v42, %v395_v39  ;;  %v390_v59 = vunpack.c.l.bf16 %v4624_v12  ;;  %v4313_v35 = vld [vmem:[%s5732_s4 + $0x30] sm:$0xff]   ;;  %v4321_v38 = vld [vmem:[#allocation2 + $0x48] sm:$0xff]   ;;  %v4322_v39 = vld [vmem:[#allocation2 + $0x40] sm:$0xff]  }
  0x37   : > { %v391_v60 = vunpack.c.h.bf16 %v4624_v12  ;;  %v422_v61 = vunpack.c.l.bf16 %v4627_v13  ;;  %v423_v63 = vunpack.c.h.bf16 %v4627_v13  ;;  %v488_v1 = vadd.f32 %v424_v50, %v392_v48  ;;  %v4323_v40 = vld [vmem:[#allocation4 + $0x78] sm:$0xff]   ;;  %v4325_v42 = vld [vmem:[#allocation4 + $0x70] sm:$0xff]   ;;  %v4337_v48 = vld [vmem:[#allocation4 + $0x40] sm:$0xff]  }
  0x38   : > { %3865 = vmatpush3.bf16.msra.mxu0 %v4596_v4  ;;  %v502_v0 = vpack.c.bf16 %v491_v55, %v490_v54  ;;  %v489_v2 = vadd.f32 %v425_v51, %v393_v49  ;;  %v388_v4 = vunpack.c.l.bf16 %v4634_v14  ;;  %v387_v17 = vunpack.c.h.bf16 %v4644_v20  ;;  %v4331_v45 = vld [vmem:[#allocation4 + $0x58] sm:$0xff]   ;;  %v4333_v46 = vld [vmem:[#allocation4 + $0x50] sm:$0xff]  }
  0x39   : > { %3897 = vmatpush3.bf16.msra.mxu1 %v4599_v5  ;;  %3866 = vmatprep.subr.bf16.mxu0 %v4602_v6  ;;  %v389_v5 = vunpack.c.h.bf16 %v4634_v14  ;;  %v418_v18 = vunpack.c.l.bf16 %v4647_v21  ;;  %v419_v19 = vunpack.c.h.bf16 %v4647_v21 }
  0x3a   : > { %3898 = vmatprep.subr.bf16.mxu1 %v4606_v7  ;;  %v501_v9 = vpack.c.bf16 %v489_v2, %v488_v1 }
  0x3b   : > { %v483_v27 = vadd.f32 %v419_v19, %v387_v17  ;;  %v4330_v19 = vld [vmem:[%s5732_s4 + $0x60] sm:$0xff]  }
  0x3c   : > { %3867 = vmatpush3.bf16.msra.mxu0 %v4602_v6  ;;  %v420_v6 = vunpack.c.l.bf16 %v4637_v15 }
  0x3d   : > { %3899 = vmatpush3.bf16.msra.mxu1 %v4606_v7  ;;  %3868 = vmatprep.subr.bf16.mxu0 %v4614_v10  ;;  %v421_v7 = vunpack.c.h.bf16 %v4637_v15 }
  0x3e   : > { %3900 = vmatprep.subr.bf16.mxu1 %v4617_v11  ;;  %v484_v23 = vadd.f32 %v420_v6, %v388_v4 }
  0x3f   : > { %v485_v24 = vadd.f32 %v421_v7, %v389_v5 }
  0x40   : > { %3869 = vmatpush3.bf16.msra.mxu0 %v4614_v10  ;;  %v486_v10 = vadd.f32 %v422_v61, %v390_v59 }
  0x41   : > { %3901 = vmatpush3.bf16.msra.mxu1 %v4617_v11  ;;  %3870 = vmatprep.subr.bf16.mxu0 %v4624_v12  ;;  %v487_v11 = vadd.f32 %v423_v63, %v391_v60  ;;  %v499_v26 = vpack.c.bf16 %v485_v24, %v484_v23 }
  0x42   : > { %3902 = vmatprep.subr.bf16.mxu1 %v4627_v13 }
  0x43   : > { %v500_v22 = vpack.c.bf16 %v487_v11, %v486_v10 }
  0x44   : > { %3871 = vmatpush3.bf16.msra.mxu0 %v4624_v12  ;;  %v4319_v12 = vld [vmem:[#allocation2 + $0x58] sm:$0xff]  }
  0x45   : > { %3903 = vmatpush3.bf16.msra.mxu1 %v4627_v13  ;;  %3872 = vmatprep.subr.bf16.mxu0 %v4634_v14  ;;  %v4302_v13 = vld [vmem:[#allocation4 + $0x28] sm:$0xff]  }
  0x46   : > { %3904 = vmatprep.subr.bf16.mxu1 %v4637_v15 }
  0x48   : > { %3873 = vmatpush3.bf16.msra.mxu0 %v4634_v14  ;;  %v386_v14 = vunpack.c.l.bf16 %v4644_v20 }
  0x49   : > { %3905 = vmatpush3.bf16.msra.mxu1 %v4637_v15  ;;  %3874 = vmatprep.subr.bf16.mxu0 %v4644_v20  ;;  %v4304_v15 = vld [vmem:[#allocation4 + $0x30] sm:$0xff]  }
  0x4a   : > { %3906 = vmatprep.subr.bf16.mxu1 %v4647_v21 }
  0x4c   : > { %3875 = vmatpush3.bf16.msra.mxu0 %v4644_v20  ;;  %v482_v20 = vadd.f32 %v418_v18, %v386_v14 }
  0x4d   : > { %3907 = vmatpush3.bf16.msra.mxu1 %v4647_v21  ;;  %3924 = vmatprep.subr.bf16.mxu0 %v505_v33  ;;  %v4307_v21 = vld [vmem:[%s5732_s4] sm:$0xff]  }
  0x4e   : > { %3956 = vmatprep.subr.bf16.mxu1 %v4315_v36  ;;  %v498_v29 = vpack.c.bf16 %v483_v27, %v482_v20  ;;  %v4332_v20 = vld [vmem:[%s5732_s4 + $0x58] sm:$0xff]  }
  0x4f   : > { %3877 = vmatmul.mubr.bf16.vlgmr.msra.gmra.mxu0 %v4293_v32  ;;  %v4310_v32 = vld [vmem:[%s5732_s4 + $0x18] sm:$0xff]  }
  0x50   : > { %3909 = vmatmul.mubr.bf16.vlgmr.msra.gmra.mxu1 %v4294_v37  ;;  %3925 = vmatpush3.bf16.msra.mxu0 %v505_v33  ;;  %v4311_v33 = vld [vmem:[%s5732_s4 + $0x20] sm:$0xff]   ;;  %v4320_v37 = vld [vmem:[#allocation2 + $0x50] sm:$0xff]  }
  0x51   : > { %3926 = vmatprep.subr.bf16.mxu0 %v504_v43  ;;  %3880 = vmatprep.mubr.bf16.mxu0 %v4295_v41  ;;  %v4324_v41 = vld [vmem:[%s5732_s4 + $0x78] sm:$0xff]  }
  0x52   : > { %3912 = vmatprep.mubr.bf16.mxu1 %v4296_v44  ;;  %3957 = vmatpush3.bf16.msra.mxu1 %v4315_v36  ;;  %v4314_v36 = vld [vmem:[%s5732_s4 + $0x38] sm:$0xff]   ;;  %v4329_v44 = vld [vmem:[#allocation4 + $0x60] sm:$0xff]  }
  0x53   : > { %3958 = vmatprep.subr.bf16.mxu1 %v4316_v47 }
  0x54   : > { %3927 = vmatpush3.bf16.msra.mxu0 %v504_v43  ;;  %v4327_v43 = vld [vmem:[#allocation4 + $0x68] sm:$0xff]  }
  0x55   : > { %3928 = vmatprep.subr.bf16.mxu0 %v503_v53 }
  0x56   : > { %3959 = vmatpush3.bf16.msra.mxu1 %v4316_v47  ;;  %v4335_v47 = vld [vmem:[#allocation4 + $0x48] sm:$0xff]  }
  0x57   : > { %3881 = vmatmul.mubr.bf16.gmra.mxu0 %v4297_v52  ;;  %3960 = vmatprep.subr.bf16.mxu1 %v4317_v56 }
  0x58   : > { %3913 = vmatmul.mubr.bf16.gmra.mxu1 %v4298_v57  ;;  %3929 = vmatpush3.bf16.msra.mxu0 %v503_v53 }
  0x59   : > { %3930 = vmatprep.subr.bf16.mxu0 %v502_v0  ;;  %3884 = vmatprep.mubr.bf16.mxu0 %v4299_v58 }
  0x5a   : > { %3916 = vmatprep.mubr.bf16.mxu1 %v4300_v62  ;;  %3961 = vmatpush3.bf16.msra.mxu1 %v4317_v56 }
  0x5b   : > { %3962 = vmatprep.subr.bf16.mxu1 %v4318_v3 }
  0x5c   : > { %3931 = vmatpush3.bf16.msra.mxu0 %v502_v0 }
  0x5d   : > { %3932 = vmatprep.subr.bf16.mxu0 %v501_v9 }
  0x5e   : > { %3963 = vmatpush3.bf16.msra.mxu1 %v4318_v3  ;;  %v4326_v3 = vld [vmem:[%s5732_s4 + $0x70] sm:$0xff]  }
  0x5f   : > { %3885 = vmatmul.mubr.bf16.gmra.mxu0 %v4301_v8  ;;  %3964 = vmatprep.subr.bf16.mxu1 %v4319_v12 }
  0x60   : > { %3917 = vmatmul.mubr.bf16.gmra.mxu1 %v4302_v13  ;;  %3933 = vmatpush3.bf16.msra.mxu0 %v501_v9  ;;  %v4328_v9 = vld [vmem:[%s5732_s4 + $0x68] sm:$0xff]  }
  0x61   : > { %3934 = vmatprep.subr.bf16.mxu0 %v500_v22  ;;  %3888 = vmatprep.mubr.bf16.mxu0 %v4303_v16 }
  0x62   : > { %3920 = vmatprep.mubr.bf16.mxu1 %v4304_v15  ;;  %3965 = vmatpush3.bf16.msra.mxu1 %v4319_v12 }
  0x63   : > { %3966 = vmatprep.subr.bf16.mxu1 %v4320_v37 }
  0x64   : > { %3935 = vmatpush3.bf16.msra.mxu0 %v500_v22 }
  0x65   : > { %3936 = vmatprep.subr.bf16.mxu0 %v499_v26 }
  0x66   : > { %3967 = vmatpush3.bf16.msra.mxu1 %v4320_v37 }
  0x67   : > { %3889 = vmatmul.mubr.bf16.gmra.mxu0 %v4305_v25  ;;  %3968 = vmatprep.subr.bf16.mxu1 %v4321_v38 }
  0x68   : > { %3921 = vmatmul.mubr.bf16.gmra.mxu1 %v4306_v28  ;;  %3937 = vmatpush3.bf16.msra.mxu0 %v499_v26 }
  0x69   : > { %3938 = vmatprep.subr.bf16.mxu0 %v498_v29  ;;  %3940 = vmatprep.mubr.bf16.mxu0 %v4307_v21 }
  0x6a   : > { %3969 = vmatpush3.bf16.msra.mxu1 %v4321_v38 }
  0x6b   : > { %3970 = vmatprep.subr.bf16.mxu1 %v4322_v39 }
  0x6c   : > { %3939 = vmatpush3.bf16.msra.mxu0 %v498_v29 }
  0x6d   : > { %3988 = vmatprep.subr.bf16.mxu0 %v4323_v40 }
  0x6e   : > { %3971 = vmatpush3.bf16.msra.mxu1 %v4322_v39 }
  0x6f   : > { %3941 = vmatmul.mubr.bf16.vlgmr.msra.gmra.mxu0 %v4308_v30  ;;  %4020 = vmatprep.subr.bf16.mxu1 %v4324_v41 }
  0x70   : > { %3944 = vmatprep.mubr.bf16.mxu0 %v4309_v31  ;;  %3989 = vmatpush3.bf16.msra.mxu0 %v4323_v40 }
  0x71   : > { %3990 = vmatprep.subr.bf16.mxu0 %v4325_v42 }
  0x74   : > { %3991 = vmatpush3.bf16.msra.mxu0 %v4325_v42 }
  0x75   : > { %3992 = vmatprep.subr.bf16.mxu0 %v4327_v43 }
  0x77   : > { %3945 = vmatmul.mubr.bf16.gmra.mxu0 %v4310_v32 }
  0x78   : > { %3948 = vmatprep.mubr.bf16.mxu0 %v4311_v33  ;;  %3993 = vmatpush3.bf16.msra.mxu0 %v4327_v43 }
  0x79   : > { %3994 = vmatprep.subr.bf16.mxu0 %v4329_v44 }
  0x7c   : > { %3995 = vmatpush3.bf16.msra.mxu0 %v4329_v44 }
  0x7d   : > { %3996 = vmatprep.subr.bf16.mxu0 %v4331_v45 }
  0x7f   : > { %3949 = vmatmul.mubr.bf16.gmra.mxu0 %v4312_v34 }
  0x80   : > { %3952 = vmatprep.mubr.bf16.mxu0 %v4313_v35  ;;  %3997 = vmatpush3.bf16.msra.mxu0 %v4331_v45  ;;  %v4334_v35 = vld [vmem:[%s5732_s4 + $0x50] sm:$0xff]  }
  0x81   : > { %3998 = vmatprep.subr.bf16.mxu0 %v4333_v46 }
  0x84   : > { %3999 = vmatpush3.bf16.msra.mxu0 %v4333_v46 }
  0x85   : > { %4000 = vmatprep.subr.bf16.mxu0 %v4335_v47 }
  0x87   : > { %3953 = vmatmul.mubr.bf16.gmra.mxu0 %v4314_v36 }
  0x88   : > { %4001 = vmatpush3.bf16.msra.mxu0 %v4335_v47 }
  0x89   : > { %4002 = vmatprep.subr.bf16.mxu0 %v4337_v48 }
  0x8c   : > { %4003 = vmatpush3.bf16.msra.mxu0 %v4337_v48 }
 0x10f   : > { %v4714_v49 = vpop.f32.mrf.mxu0 }
 0x110   : > { %v4716_v50 = vpop.f32.mrf.mxu1 }
 0x111   : > { %v4718_v51 = vpop.f32.mrf.mxu0  ;;  %v4746_v61 = vsub.f32 %v4714_v49, %v4716_v50 }
 0x112   : > { %v4720_v52 = vpop.f32.mrf.mxu1 }
 0x113   : > { %v4722_v53 = vpop.f32.mrf.mxu0  ;;  %v4736_v58 = vsub.f32 %v4718_v51, %v4720_v52 }
 0x114   : > { %v4724_v54 = vpop.f32.mrf.mxu1 }
 0x115   : > { %v4726_v55 = vpop.f32.mrf.mxu0  ;;  %v4730_v56 = vsub.f32 %v4722_v53, %v4724_v54 }
 0x116   : > { %v4732_v57 = vpop.f32.mrf.mxu1 }
 0x117   : > { %v4740_v59 = vsub.f32 %v4726_v55, %v4732_v57  ;;  %v4742_v60 = vpop.f32.mrf.mxu0  ;;  %v1137_v1 = vpack.c.bf16 %v4730_v56, %v4746_v61 }
 0x118   : > { %v4748_v62 = vpop.f32.mrf.mxu1 }
 0x119   : > { %v1136_v63 = vpack.c.bf16 %v4740_v59, %v4736_v58  ;;  %v4752_v0 = vpop.f32.mrf.mxu0  ;;  %v4788_v13 = vsub.f32 %v4742_v60, %v4748_v62 }
 0x11a   : > { %v4756_v2 = vpop.f32.mrf.mxu1 }
 0x11b   : > { %3972 = vmatprep.mubr.bf16.mxu1 %v1136_v63  ;;  %v4761_v4 = vpop.f32.mrf.mxu0  ;;  %v4778_v10 = vsub.f32 %v4752_v0, %v4756_v2 }
 0x11c   : > { %v4763_v5 = vpop.f32.mrf.mxu1  ;;  %3973 = vmatmul.mubr.bf16.vlgmr.msra.gmra.mxu1 %v1137_v1  ;;  %v4338_v1 = vld [vmem:[%s5732_s4 + $0x40] sm:$0xff]  }
 0x11d   : > { %v4765_v6 = vpop.f32.mrf.mxu0  ;;  %4021 = vmatpush3.bf16.msra.mxu1 %v4324_v41  ;;  %v4769_v7 = vsub.f32 %v4761_v4, %v4763_v5  ;;  %v4336_v41 = vld [vmem:[%s5732_s4 + $0x48] sm:$0xff]  }
 0x11e   : > { %v4771_v8 = vpop.f32.mrf.mxu1  ;;  %4022 = vmatprep.subr.bf16.mxu1 %v4326_v3 }
 0x11f   : > { %v4782_v11 = vsub.f32 %v4765_v6, %v4771_v8  ;;  %v4784_v12 = vpop.f32.mrf.mxu0  ;;  %v1139_v18 = vpack.c.bf16 %v4769_v7, %v4788_v13 }
 0x120   : > { %v4790_v16 = vpop.f32.mrf.mxu1 }
 0x121   : > { %v1138_v14 = vpack.c.bf16 %v4782_v11, %v4778_v10  ;;  %v4794_v17 = vpop.f32.mrf.mxu0  ;;  %4023 = vmatpush3.bf16.msra.mxu1 %v4326_v3  ;;  %v4830_v29 = vsub.f32 %v4784_v12, %v4790_v16 }
 0x122   : > { %v4798_v15 = vpop.f32.mrf.mxu1  ;;  %4024 = vmatprep.subr.bf16.mxu1 %v4328_v9 }
 0x123   : > { %3976 = vmatprep.mubr.bf16.mxu1 %v1138_v14  ;;  %v4803_v22 = vpop.f32.mrf.mxu0  ;;  %v4820_v27 = vsub.f32 %v4794_v17, %v4798_v15 }
 0x124   : > { %v4805_v23 = vpop.f32.mrf.mxu1  ;;  %3977 = vmatmul.mubr.bf16.gmra.mxu1 %v1139_v18 }
 0x125   : > { %v4807_v24 = vpop.f32.mrf.mxu0  ;;  %4025 = vmatpush3.bf16.msra.mxu1 %v4328_v9  ;;  %v4811_v25 = vsub.f32 %v4803_v22, %v4805_v23 }
 0x126   : > { %v4813_v26 = vpop.f32.mrf.mxu1  ;;  %4026 = vmatprep.subr.bf16.mxu1 %v4330_v19 }
 0x127   : > { %v4824_v28 = vsub.f32 %v4807_v24, %v4813_v26  ;;  %v4826_v21 = vpop.f32.mrf.mxu0  ;;  %v1141_v33 = vpack.c.bf16 %v4811_v25, %v4830_v29 }
 0x128   : > { %v4832_v30 = vpop.f32.mrf.mxu1 }
 0x129   : > { %v1140_v31 = vpack.c.bf16 %v4824_v28, %v4820_v27  ;;  %v4836_v32 = vpop.f32.mrf.mxu0  ;;  %4027 = vmatpush3.bf16.msra.mxu1 %v4330_v19  ;;  %v4870_v45 = vsub.f32 %v4826_v21, %v4832_v30 }
 0x12a   : > { %v4840_v34 = vpop.f32.mrf.mxu1  ;;  %4028 = vmatprep.subr.bf16.mxu1 %v4332_v20 }
 0x12b   : > { %3980 = vmatprep.mubr.bf16.mxu1 %v1140_v31  ;;  %v4845_v36 = vpop.f32.mrf.mxu0  ;;  %v4862_v42 = vsub.f32 %v4836_v32, %v4840_v34 }
 0x12c   : > { %v4847_v37 = vpop.f32.mrf.mxu1  ;;  %3981 = vmatmul.mubr.bf16.gmra.mxu1 %v1141_v33 }
 0x12d   : > { %v4849_v38 = vpop.f32.mrf.mxu0  ;;  %4029 = vmatpush3.bf16.msra.mxu1 %v4332_v20  ;;  %v4853_v39 = vsub.f32 %v4845_v36, %v4847_v37 }
 0x12e   : > { %v4855_v40 = vpop.f32.mrf.mxu1  ;;  %4030 = vmatprep.subr.bf16.mxu1 %v4334_v35 }
 0x12f   : > { %v4866_v43 = vsub.f32 %v4849_v38, %v4855_v40  ;;  %v3942_v44 = vpop.f32.mrf.mxu0  ;;  %v1143_v48 = vpack.c.bf16 %v4853_v39, %v4870_v45 }
 0x130   : > { %v1055_v3 = vsub.f32 %v3942_v44, %v4714_v49 }
 0x131   : > { %v1142_v46 = vpack.c.bf16 %v4866_v43, %v4862_v42  ;;  %v974_v47 = vpop.f32.mrf.mxu0  ;;  %4031 = vmatpush3.bf16.msra.mxu1 %v4334_v35 }
 0x132   : > { %v1053_v63 = vsub.f32 %v974_v47, %v4718_v51  ;;  %4032 = vmatprep.subr.bf16.mxu1 %v4336_v41  ;;  %v1071_v31 = vsub.f32 %v1055_v3, %v4716_v50 }
 0x133   : > { %3984 = vmatprep.mubr.bf16.mxu1 %v1142_v46  ;;  %v3943_v9 = vpop.f32.mrf.mxu0 }
 0x134   : > { %v1056_v14 = vsub.f32 %v3943_v9, %v4722_v53  ;;  %3985 = vmatmul.mubr.bf16.gmra.mxu1 %v1143_v48  ;;  %v1069_v19 = vsub.f32 %v1053_v63, %v4720_v52 }
 0x135   : > { %v977_v18 = vpop.f32.mrf.mxu0  ;;  %4033 = vmatpush3.bf16.msra.mxu1 %v4336_v41 }
 0x136   : > { %v1072_v20 = vsub.f32 %v1056_v14, %v4724_v54  ;;  %v1054_v51 = vsub.f32 %v977_v18, %v4726_v55  ;;  %4034 = vmatprep.subr.bf16.mxu1 %v4338_v1  ;;  %v1152_v53 = vadd.f32 %v1069_v19, %v4736_v58  ;;  %v1154_v54 = vadd.f32 %v1071_v31, %v4746_v61 }
 0x137   : > { %v3946_v33 = vpop.f32.mrf.mxu0 }
 0x138   : > { %v1070_v35 = vsub.f32 %v1054_v51, %v4732_v57  ;;  %v1155_v49 = vadd.f32 %v1072_v20, %v4730_v56  ;;  %v1059_v55 = vsub.f32 %v3946_v33, %v4742_v60  ;;  %v1145_v50 = vpack.c.bf16 %v1072_v20, %v1071_v31 }
 0x139   : > { %v990_v44 = vpop.f32.mrf.mxu0  ;;  %4035 = vmatpush3.bf16.msra.mxu1 %v4338_v1 }
 0x13a   : > { %v1153_v41 = vadd.f32 %v1070_v35, %v4740_v59  ;;  %v1057_v52 = vsub.f32 %v990_v44, %v4752_v0  ;;  %v1144_v47 = vpack.c.bf16 %v1070_v35, %v1069_v19  ;;  %v1169_v63 = vpack.c.bf16 %v1155_v49, %v1154_v54 }
 0x13b   : > { %v3947_v46 = vpop.f32.mrf.mxu0  ;;  %v1075_v61 = vsub.f32 %v1059_v55, %v4748_v62 }
 0x13c   : > { %v1060_v48 = vsub.f32 %v3947_v46, %v4761_v4  ;;  %v1168_v57 = vpack.c.bf16 %v1153_v41, %v1152_v53  ;;  %4004 = vmatprep.mubr.bf16.mxu0 %v1144_v47  ;;  %v1073_v1 = vsub.f32 %v1057_v52, %v4756_v2 }
 0x13d   : > { %v993_v56 = vpop.f32.mrf.mxu0  ;;  %4005 = vmatmul.mubr.bf16.vlgmr.msra.gmra.mxu0 %v1145_v50  ;;  %v4340_v50 = vld [vmem:[#allocation4 + $0x80] sm:$0xff]  }
 0x13e   : > { %v1076_v58 = vsub.f32 %v1060_v48, %v4763_v5  ;;  %v1058_v59 = vsub.f32 %v993_v56, %v4765_v6  ;;  %4036 = vmatprep.mubr.bf16.mxu1 %v1168_v57  ;;  %v1156_v9 = vadd.f32 %v1073_v1, %v4778_v10  ;;  %v1158_v6 = vadd.f32 %v1075_v61, %v4788_v13 }
 0x13f   : > { %v3950_v60 = vpop.f32.mrf.mxu0  ;;  %4037 = vmatmul.mubr.bf16.vlgmr.msra.gmra.mxu1 %v1169_v63 }
 0x140   : > { %v1074_v0 = vsub.f32 %v1058_v59, %v4771_v8  ;;  %v1159_v4 = vadd.f32 %v1076_v58, %v4769_v7  ;;  %v1063_v18 = vsub.f32 %v3950_v60, %v4784_v12  ;;  %v1147_v20 = vpack.c.bf16 %v1076_v58, %v1075_v61 }
 0x141   : > { %v1006_v3 = vpop.f32.mrf.mxu0 }
 0x142   : > { %v1157_v14 = vadd.f32 %v1074_v0, %v4782_v11  ;;  %v1061_v2 = vsub.f32 %v1006_v3, %v4794_v17  ;;  %v1146_v5 = vpack.c.bf16 %v1074_v0, %v1073_v1  ;;  %v1171_v7 = vpack.c.bf16 %v1159_v4, %v1158_v6  ;;  %v4958_v0 = vld [vmem:[%s5733_s5 + $0x8] sm:$0xff]  }
 0x143   : > { %v3951_v19 = vpop.f32.mrf.mxu0  ;;  %v1079_v13 = vsub.f32 %v1063_v18, %v4790_v16  ;;  %v4963_v4 = vld [vmem:[%s5734_s6 + $0x8] sm:$0xff]   ;;  %v3502_v6 = vunpack.c.l.bf16 %v4958_v0 }
 0x144   : > { %v1064_v62 = vsub.f32 %v3951_v19, %v4803_v22  ;;  %4008 = vmatprep.mubr.bf16.mxu0 %v1146_v5  ;;  %v1170_v8 = vpack.c.bf16 %v1157_v14, %v1156_v9  ;;  %v1077_v31 = vsub.f32 %v1061_v2, %v4798_v15  ;;  %v4970_v9 = vld [vmem:[%s5733_s5] sm:$0xff]   ;;  %v4980_v2 = vld [vmem:[%s5733_s5 + $0x18] sm:$0xff]   ;;  %v3534_v18 = vunpack.c.l.bf16 %v4963_v4  ;;  %v4992_v19 = vld [vmem:[%s5733_s5 + $0x10] sm:$0xff]  }
 0x145   : > { %v1009_v51 = vpop.f32.mrf.mxu0  ;;  %4009 = vmatmul.mubr.bf16.gmra.mxu0 %v1147_v20  ;;  %v4975_v14 = vld [vmem:[%s5734_s6] sm:$0xff]   ;;  %v4985_v5 = vld [vmem:[%s5734_s6 + $0x18] sm:$0xff]   ;;  %v3498_v20 = vunpack.c.l.bf16 %v4970_v9 }
 0x146   : > { %v1080_v10 = vsub.f32 %v1064_v62, %v4805_v23  ;;  %v1062_v11 = vsub.f32 %v1009_v51, %v4807_v24  ;;  %4040 = vmatprep.mubr.bf16.mxu1 %v1170_v8  ;;  %v1160_v35 = vadd.f32 %v1077_v31, %v4820_v27  ;;  %v1162_v24 = vadd.f32 %v1079_v13, %v4830_v29  ;;  %v4997_v62 = vld [vmem:[%s5734_s6 + $0x10] sm:$0xff]  }
 0x147   : > { %v3954_v17 = vpop.f32.mrf.mxu0  ;;  %4041 = vmatmul.mubr.bf16.gmra.mxu1 %v1171_v7  ;;  %v3530_v8 = vunpack.c.l.bf16 %v4975_v14  ;;  %v3503_v51 = vunpack.c.h.bf16 %v4958_v0  ;;  %v3535_v7 = vunpack.c.h.bf16 %v4963_v4 }
 0x148   : > { %v1078_v12 = vsub.f32 %v1062_v11, %v4813_v26  ;;  %v1163_v22 = vadd.f32 %v1080_v10, %v4811_v25  ;;  %v1067_v44 = vsub.f32 %v3954_v17, %v4826_v21  ;;  %v1149_v41 = vpack.c.bf16 %v1080_v10, %v1079_v13  ;;  %v5011_v10 = vld [vmem:[%s5734_s6 + $0x28] sm:$0xff]  }
 0x149   : > { %v1022_v33 = vpop.f32.mrf.mxu0  ;;  %v3499_v13 = vunpack.c.h.bf16 %v4970_v9  ;;  %v3531_v17 = vunpack.c.h.bf16 %v4975_v14 }
 0x14a   : > { %v1161_v49 = vadd.f32 %v1078_v12, %v4824_v28  ;;  %v1065_v15 = vsub.f32 %v1022_v33, %v4836_v32  ;;  %v1148_v23 = vpack.c.bf16 %v1078_v12, %v1077_v31  ;;  %v1173_v25 = vpack.c.bf16 %v1163_v22, %v1162_v24  ;;  %v5006_v31 = vld [vmem:[%s5733_s5 + $0x28] sm:$0xff]   ;;  %v5022_v33 = vld [vmem:[%s5733_s5 + $0x20] sm:$0xff]  }
 0x14b   : > { %v3955_v53 = vpop.f32.mrf.mxu0  ;;  %v1083_v29 = vsub.f32 %v1067_v44, %v4832_v30  ;;  %v4339_v30 = vld [vmem:[#allocation2 + $0x80] sm:$0xff]   ;;  %v3510_v12 = vunpack.c.l.bf16 %v4980_v2  ;;  %v3542_v22 = vunpack.c.l.bf16 %v4985_v5 }
 0x14c   : > { %v1068_v16 = vsub.f32 %v3955_v53, %v4845_v36  ;;  %4012 = vmatprep.mubr.bf16.mxu0 %v1148_v23  ;;  %v1172_v26 = vpack.c.bf16 %v1161_v49, %v1160_v35  ;;  %v1081_v54 = vsub.f32 %v1065_v15, %v4840_v34  ;;  %v5027_v35 = vld [vmem:[%s5734_s6 + $0x20] sm:$0xff]   ;;  %v3506_v15 = vunpack.c.l.bf16 %v4992_v19 }
 0x14d   : > { %v1025_v52 = vpop.f32.mrf.mxu0  ;;  %4013 = vmatmul.mubr.bf16.gmra.mxu0 %v1149_v41  ;;  %v1166_v34 = vadd.f32 %v1083_v29, %v4870_v45 }
 0x14e   : > { %v1084_v27 = vsub.f32 %v1068_v16, %v4847_v37  ;;  %v1066_v28 = vsub.f32 %v1025_v52, %v4849_v38  ;;  %4044 = vmatprep.mubr.bf16.mxu1 %v1172_v26  ;;  %v1164_v36 = vadd.f32 %v1081_v54, %v4862_v42 }
 0x14f   : > { %4045 = vmatmul.mubr.bf16.gmra.mxu1 %v1173_v25  ;;  %v5040_v25 = vld [vmem:[%s5733_s5 + $0x38] sm:$0xff]  }
 0x150   : > { %v1082_v21 = vsub.f32 %v1066_v28, %v4855_v40  ;;  %v1167_v32 = vadd.f32 %v1084_v27, %v4853_v39  ;;  %v1151_v37 = vpack.c.bf16 %v1084_v27, %v1083_v29 }
 0x152   : > { %v1165_v55 = vadd.f32 %v1082_v21, %v4866_v43  ;;  %v1150_v46 = vpack.c.bf16 %v1082_v21, %v1081_v54  ;;  %v1175_v38 = vpack.c.bf16 %v1167_v32, %v1166_v34  ;;  %v5045_v54 = vld [vmem:[%s5734_s6 + $0x38] sm:$0xff]  }
 0x154   : > { %4016 = vmatprep.mubr.bf16.mxu0 %v1150_v46  ;;  %v1174_v47 = vpack.c.bf16 %v1165_v55, %v1164_v36  ;;  %v5054_v36 = vld [vmem:[%s5733_s5 + $0x30] sm:$0xff]  }
 0x155   : > { %4017 = vmatmul.mubr.bf16.gmra.mxu0 %v1151_v37  ;;  %v5059_v55 = vld [vmem:[%s5734_s6 + $0x30] sm:$0xff]  }
 0x156   : > { %4048 = vmatprep.mubr.bf16.mxu1 %v1174_v47  ;;  %4068 = vmatprep.mubr.bf16.mxu0 %v4339_v30 }
 0x157   : > { %4049 = vmatmul.mubr.bf16.gmra.mxu1 %v1175_v38 }
 0x158   : > { %4100 = vmatprep.mubr.bf16.mxu1 %v4340_v50 }
 0x1dc   : > { %v4927_v40 = vpop.f32.mrf.mxu1 }
 0x1de   : > { %v4929_v39 = vpop.f32.mrf.mxu1 }
 0x1e0   : > { %v4931_v42 = vpop.f32.mrf.mxu1 }
 0x1e2   : > { %v4933_v43 = vpop.f32.mrf.mxu1 }
 0x1e4   : > { %v4935_v45 = vpop.f32.mrf.mxu1 }
 0x1e6   : > { %v4937_v48 = vpop.f32.mrf.mxu1 }
 0x1e8   : > { %v4939_v57 = vpop.f32.mrf.mxu1 }
 0x1ea   : > { %v4941_v63 = vpop.f32.mrf.mxu1 }
 0x1ec   : > { %v4943_v56 = vpop.f32.mrf.mxu1 }
 0x1ee   : > { %v4945_v1 = vpop.f32.mrf.mxu1 }
 0x1f0   : > { %v4947_v58 = vpop.f32.mrf.mxu1 }
 0x1f2   : > { %v4949_v59 = vpop.f32.mrf.mxu1 }
 0x1f4   : > { %v4951_v61 = vpop.f32.mrf.mxu1 }
 0x1f6   : > { %v4953_v60 = vpop.f32.mrf.mxu1 }
 0x1f8   : > { %v4965_v3 = vpop.f32.mrf.mxu1 }
 0x1fa   : > { %v5013_v11 = vpop.f32.mrf.mxu1 }
 0x1fd   : > { %v4006_v49 = vpop.f32.mrf.mxu0 }
 0x1fe   : > { %v1613_v46 = vsub.f32 %v4927_v40, %v4006_v49 }
 0x1ff   : > { %v4038_v53 = vpop.f32.mrf.mxu1  ;;  %v1403_v27 = vpop.f32.mrf.mxu0 }
 0x200   : > { %v1629_v28 = vsub.f32 %v4038_v53, %v4927_v40  ;;  %v1611_v29 = vsub.f32 %v4929_v39, %v1403_v27  ;;  %v1725_v21 = vmul.f32 %v3502_v6, %v1613_v46  ;;  %v1773_v41 = vmul.f32 %v3534_v18, %v1613_v46 }
 0x201   : > { %v1548_v34 = vpop.f32.mrf.mxu1  ;;  %v4007_v50 = vpop.f32.mrf.mxu0 }
 0x202   : > { %v1645_v30 = vsub.f32 %v1629_v28, %v4006_v49  ;;  %v1627_v53 = vsub.f32 %v1548_v34, %v4929_v39  ;;  %v1614_v47 = vsub.f32 %v4931_v42, %v4007_v50 }
 0x203   : > { %v4039_v52 = vpop.f32.mrf.mxu1  ;;  %v1406_v38 = vpop.f32.mrf.mxu0 }
 0x204   : > { %v1630_v49 = vsub.f32 %v4039_v52, %v4931_v42  ;;  %v1643_v39 = vsub.f32 %v1627_v53, %v1403_v27  ;;  %v1612_v32 = vsub.f32 %v4933_v43, %v1406_v38  ;;  %v1741_v37 = vmul.f32 %v3534_v18, %v1645_v30 }
 0x205   : > { %v1551_v40 = vpop.f32.mrf.mxu1  ;;  %v4010_v44 = vpop.f32.mrf.mxu0  ;;  %v5083_v42 = vmul.f32 %v3498_v20, %v1611_v29  ;;  %v5087_v52 = vmul.f32 %v3530_v8, %v1611_v29  ;;  %v1789_v27 = vmul.f32 %v3502_v6, %v1645_v30  ;;  %v1726_v18 = vmul.f32 %v3503_v51, %v1614_v47 }
 0x206   : > { %v1646_v16 = vsub.f32 %v1630_v49, %v4007_v50  ;;  %v1628_v24 = vsub.f32 %v1551_v40, %v4933_v43  ;;  %v1617_v53 = vsub.f32 %v4935_v45, %v4010_v44  ;;  %v5096_v43 = vmul.f32 %v3535_v7, %v1614_v47 }
 0x207   : > { %v4042_v26 = vpop.f32.mrf.mxu1  ;;  %v1419_v50 = vpop.f32.mrf.mxu0  ;;  %v5103_v40 = vmul.f32 %v3530_v8, %v1643_v39  ;;  %v5107_v6 = vmul.f32 %v3498_v20, %v1643_v39  ;;  %v5111_v30 = vmul.f32 %v3499_v13, %v1612_v32  ;;  %v5115_v4 = vmul.f32 %v3531_v17, %v1612_v32 }
 0x208   : > { %v1742_v46 = vmul.f32 %v3535_v7, %v1646_v16  ;;  %v1633_v29 = vsub.f32 %v4042_v26, %v4935_v45  ;;  %v1644_v47 = vsub.f32 %v1628_v24, %v1406_v38  ;;  %v1615_v45 = vsub.f32 %v4937_v48, %v1419_v50 }
 0x209   : > { %v1564_v49 = vpop.f32.mrf.mxu1  ;;  %v4011_v7 = vpop.f32.mrf.mxu0  ;;  %v5119_v26 = vsub.f32 %v1725_v21, %v1741_v37  ;;  %v5123_v20 = vmul.f32 %v3503_v51, %v1646_v16  ;;  %v1729_v39 = vmul.f32 %v3510_v12, %v1617_v53  ;;  %v1777_v32 = vmul.f32 %v3542_v22, %v1617_v53 }
 0x20a   : > { %v1631_v8 = vsub.f32 %v1564_v49, %v4937_v48  ;;  %v1649_v24 = vsub.f32 %v1633_v29, %v4010_v44  ;;  %v5127_v34 = vsub.f32 %v1726_v18, %v1742_v46  ;;  %v1618_v28 = vsub.f32 %v4939_v57, %v4011_v7 }
 0x20b   : > { %5746 = vst [vmem:[#allocation8_spill] sm:$0xff] %v5119_v26  ;;  %v4043_v38 = vpop.f32.mrf.mxu1  ;;  %v1422_v23 = vpop.f32.mrf.mxu0  ;;  %v5133_v21 = vadd.f32 %v1789_v27, %v1773_v41  ;;  %v5137_v0 = vmul.f32 %v3531_v17, %v1644_v47  ;;  %v5146_v53 = vmul.f32 %v3499_v13, %v1644_v47  ;;  %v5750_v27 = vunpack.c.l.bf16 %v4997_v62 }
 0x20c   : > { %5747 = vst [vmem:[#allocation9_spill] sm:$0xff] %v5127_v34  ;;  %v1634_v48 = vsub.f32 %v4043_v38, %v4939_v57  ;;  %v1647_v51 = vsub.f32 %v1631_v8, %v1419_v50  ;;  %v1616_v44 = vsub.f32 %v4941_v63, %v1422_v23  ;;  %v5142_v37 = vpack.c.bf16 %v5127_v34, %v5119_v26 }
 0x20d   : > { %5748 = vst [vmem:[#allocation10_spill] sm:$0xff] %v5133_v21  ;;  %v1567_v16 = vpop.f32.mrf.mxu1  ;;  %v5150_v57 = vmul.f32 %v3506_v15, %v1615_v45  ;;  %v4014_v14 = vpop.f32.mrf.mxu0  ;;  %v5155_v18 = vmul.f32 %v5750_v27, %v1615_v45  ;;  %v1745_v46 = vmul.f32 %v3542_v22, %v1649_v24  ;;  %v1793_v9 = vmul.f32 %v3510_v12, %v1649_v24 }
 0x20e   : > { %5749 = vst [vmem:[#allocation11_spill] sm:$0xff] %v5142_v37  ;;  %v1650_v41 = vsub.f32 %v1634_v48, %v4011_v7  ;;  %v1632_v17 = vsub.f32 %v1567_v16, %v4941_v63  ;;  %v1621_v13 = vsub.f32 %v4943_v56, %v4014_v14  ;;  %v5751_v29 = vunpack.c.h.bf16 %v4980_v2 }
 0x20f   : > { %v4046_v50 = vpop.f32.mrf.mxu1  ;;  %v5752_v49 = vunpack.c.h.bf16 %v4985_v5  ;;  %v1435_v8 = vpop.f32.mrf.mxu0  ;;  %v5754_v22 = vmov %v5750_v27  ;;  %v5177_v12 = vmul.f32 %v3506_v15, %v1647_v51  ;;  %v5755_v24 = vunpack.c.h.bf16 %v4992_v19 }
 0x210   : > { %v1730_v47 = vmul.f32 %v5751_v29, %v1618_v28  ;;  %v1637_v38 = vsub.f32 %v4046_v50, %v4943_v56  ;;  %v5173_v48 = vmul.f32 %v5754_v22, %v1647_v51  ;;  %v5756_v5 = vunpack.c.h.bf16 %v4997_v62 }
 0x211   : > { %v5166_v7 = vmul.f32 %v5752_v49, %v1618_v28  ;;  %v5753_v63 = vmov %v5752_v49  ;;  %v5181_v16 = vmul.f32 %v5755_v24, %v1616_v44  ;;  %v1648_v28 = vsub.f32 %v1632_v17, %v1422_v23  ;;  %v1580_v27 = vpop.f32.mrf.mxu1  ;;  %v4015_v49 = vpop.f32.mrf.mxu0 }
 0x212   : > { %v1746_v45 = vmul.f32 %v5753_v63, %v1650_v41  ;;  %v5185_v29 = vmul.f32 %v5756_v5, %v1616_v44  ;;  %v1619_v56 = vsub.f32 %v4945_v1, %v1435_v8  ;;  %v1653_v50 = vsub.f32 %v1637_v38, %v4014_v14 }
 0x213   : > { %v1635_v63 = vsub.f32 %v1580_v27, %v4945_v1  ;;  %v5757_v22 = vunpack.c.h.bf16 %v4980_v2  ;;  %v5758_v51 = vunpack.c.l.bf16 %v5006_v31  ;;  %v4047_v37 = vpop.f32.mrf.mxu1  ;;  %v5195_v23 = vsub.f32 %v1729_v39, %v1745_v46  ;;  %v1438_v34 = vpop.f32.mrf.mxu0 }
 0x214   : > { %v5197_v17 = vsub.f32 %v1730_v47, %v1746_v45  ;;  %v5761_v44 = vunpack.c.l.bf16 %v5011_v10  ;;  %v1622_v14 = vsub.f32 %v4947_v58, %v4015_v49  ;;  %v1638_v1 = vsub.f32 %v4047_v37, %v4947_v58 }
 0x215   : > { %v5191_v15 = vmul.f32 %v5757_v22, %v1650_v41  ;;  %v1733_v24 = vmul.f32 %v5758_v51, %v1621_v13  ;;  %5759 = vst [vmem:[#allocation12_spill] sm:$0xff] %v5195_v23  ;;  %v1651_v38 = vsub.f32 %v1635_v63, %v1435_v8  ;;  %v5762_v2 = vunpack.c.h.bf16 %v4997_v62  ;;  %v1583_v22 = vpop.f32.mrf.mxu1  ;;  %v4018_v8 = vpop.f32.mrf.mxu0 }
 0x216   : > { %5760 = vst [vmem:[#allocation13_spill] sm:$0xff] %v5197_v17  ;;  %v1781_v5 = vmul.f32 %v5761_v44, %v1621_v13  ;;  %v1620_v27 = vsub.f32 %v4949_v59, %v1438_v34  ;;  %v5210_v39 = vpack.c.bf16 %v5197_v17, %v5195_v23  ;;  %v5212_v46 = vadd.f32 %v1793_v9, %v1777_v32 }
 0x217   : > { %v5205_v41 = vmul.f32 %v5762_v2, %v1648_v28  ;;  %v5764_v13 = vunpack.c.h.bf16 %v4992_v19  ;;  %v5765_v45 = vunpack.c.l.bf16 %v5022_v33  ;;  %v5767_v62 = vmov %v5761_v44  ;;  %v4050_v2 = vpop.f32.mrf.mxu1 }
 0x218   : > { %5763 = vst [vmem:[#allocation14_spill] sm:$0xff] %v5210_v39  ;;  %v1749_v37 = vmul.f32 %v5767_v62, %v1653_v50  ;;  %v1636_v63 = vsub.f32 %v1583_v22, %v4949_v59  ;;  %v5768_v51 = vunpack.c.l.bf16 %v5027_v35  ;;  %v5770_v32 = vunpack.c.l.bf16 %v5006_v31  ;;  %v1451_v22 = vpop.f32.mrf.mxu0 }
 0x219   : > { %v5216_v47 = vmul.f32 %v5764_v13, %v1648_v28  ;;  %v5220_v58 = vmul.f32 %v5765_v45, %v1619_v56  ;;  %v1654_v19 = vsub.f32 %v1638_v1, %v4015_v49  ;;  %v1625_v28 = vsub.f32 %v4951_v61, %v4018_v8 }
 0x21a   : > { %v5227_v44 = vmul.f32 %v5768_v51, %v1619_v56  ;;  %v1797_v9 = vmul.f32 %v5770_v32, %v1653_v50  ;;  %v5771_v13 = vunpack.c.h.bf16 %v5006_v31  ;;  %v5772_v39 = vunpack.c.h.bf16 %v5011_v10  ;;  %v4019_v23 = vpop.f32.mrf.mxu0 }
 0x21b   : > { %5766 = vst [vmem:[#allocation15_spill] sm:$0xff] %v5220_v58  ;;  %v5773_v26 = vmov %v5768_v51  ;;  %v1641_v56 = vsub.f32 %v4050_v2, %v4951_v61  ;;  %v5775_v51 = vunpack.c.l.bf16 %v5022_v33  ;;  %v5777_v49 = vunpack.c.h.bf16 %v5022_v33 }
 0x21c   : > { %5769 = vst [vmem:[#allocation16_spill] sm:$0xff] %v5227_v44  ;;  %v1734_v45 = vmul.f32 %v5771_v13, %v1622_v14  ;;  %v1782_v62 = vmul.f32 %v5772_v39, %v1622_v14  ;;  %v5238_v59 = vmul.f32 %v5773_v26, %v1651_v38  ;;  %v5778_v32 = vunpack.c.h.bf16 %v5027_v35  ;;  %v1596_v39 = vpop.f32.mrf.mxu1  ;;  %v1454_v58 = vpop.f32.mrf.mxu0 }
 0x21d   : > { %v5243_v50 = vmul.f32 %v5775_v51, %v1651_v38  ;;  %v5247_v1 = vmul.f32 %v5777_v49, %v1620_v27  ;;  %v1652_v14 = vsub.f32 %v1636_v63, %v1438_v34  ;;  %v1623_v26 = vsub.f32 %v4953_v60, %v1451_v22 }
 0x21e   : > { %5774 = vst [vmem:[#allocation17_spill] sm:$0xff] %v5238_v59  ;;  %v5251_v13 = vmul.f32 %v5778_v32, %v1620_v27  ;;  %v1657_v17 = vsub.f32 %v1641_v56, %v4018_v8  ;;  %v1639_v61 = vsub.f32 %v1596_v39, %v4953_v60  ;;  %v5255_v2 = vsub.f32 %v1733_v24, %v1749_v37  ;;  %v4051_v63 = vpop.f32.mrf.mxu1 }
 0x21f   : > { %5776 = vst [vmem:[#allocation18_spill] sm:$0xff] %v5243_v50  ;;  %v5780_v38 = vunpack.c.h.bf16 %v5011_v10  ;;  %v5781_v49 = vunpack.c.h.bf16 %v5006_v31  ;;  %v5782_v44 = vunpack.c.l.bf16 %v5040_v25  ;;  %v1626_v34 = vsub.f32 %v4965_v3, %v4019_v23 }
 0x220   : > { %5779 = vst [vmem:[#allocation19_spill] sm:$0xff] %v5251_v13  ;;  %v5783_v32 = vunpack.c.l.bf16 %v5045_v54  ;;  %v1655_v56 = vsub.f32 %v1639_v61, %v1451_v22  ;;  %v1642_v60 = vsub.f32 %v4051_v63, %v4965_v3  ;;  %v5267_v24 = vadd.f32 %v1797_v9, %v1781_v5 }
 0x221   : > { %v1750_v51 = vmul.f32 %v5780_v38, %v1654_v19  ;;  %v1798_v50 = vmul.f32 %v5781_v49, %v1654_v19  ;;  %v1737_v27 = vmul.f32 %v5782_v44, %v1625_v28  ;;  %v5784_v10 = vunpack.c.h.bf16 %v5027_v35  ;;  %v1599_v49 = vpop.f32.mrf.mxu1 }
 0x222   : > { %v1785_v8 = vmul.f32 %v5783_v32, %v1625_v28  ;;  %v5785_v31 = vmov %v5783_v32  ;;  %v1801_v39 = vmul.f32 %v5782_v44, %v1657_v17  ;;  %v1624_v38 = vsub.f32 %v5013_v11, %v1454_v58 }
 0x223   : > { %v1748_v37 = vmul.f32 %v5784_v10, %v1652_v14  ;;  %v1753_v19 = vmul.f32 %v5785_v31, %v1657_v17  ;;  %v5786_v28 = vunpack.c.l.bf16 %v5054_v36  ;;  %v5787_v61 = vunpack.c.l.bf16 %v5059_v55 }
 0x224   : > { %v1658_v5 = vsub.f32 %v1642_v60, %v4019_v23  ;;  %v1640_v9 = vsub.f32 %v1599_v49, %v5013_v11  ;;  %v5788_v35 = vunpack.c.h.bf16 %v5040_v25  ;;  %v5287_v44 = vsub.f32 %v1734_v45, %v1750_v51 }
 0x225   : > { %v1735_v22 = vmul.f32 %v5786_v28, %v1623_v26  ;;  %v1783_v3 = vmul.f32 %v5787_v61, %v1623_v26  ;;  %v5789_v32 = vmov %v5787_v61  ;;  %v5790_v17 = vmov %v5786_v28 }
 0x226   : > { %v1738_v63 = vmul.f32 %v5788_v35, %v1626_v34  ;;  %v1751_v10 = vmul.f32 %v5789_v32, %v1655_v56  ;;  %v1799_v31 = vmul.f32 %v5790_v17, %v1655_v56  ;;  %v5791_v59 = vunpack.c.h.bf16 %v5045_v54  ;;  %v5806_v17 = vld [vmem:[#allocation13_spill] sm:$0xff] }
 0x227   : > { %v5793_v23 = vmov %v5788_v35  ;;  %v1656_v60 = vsub.f32 %v1640_v9, %v1454_v58  ;;  %v5794_v49 = vunpack.c.h.bf16 %v5054_v36  ;;  %v5795_v35 = vunpack.c.h.bf16 %v5059_v55 }
 0x228   : > { %v1786_v28 = vmul.f32 %v5791_v59, %v1626_v34  ;;  %v5792_v21 = vmov %v5791_v59  ;;  %v1802_v11 = vmul.f32 %v5793_v23, %v1658_v5  ;;  %v5299_v13 = vsub.f32 %v1737_v27, %v1753_v19 }
 0x229   : > { %v1754_v26 = vmul.f32 %v5792_v21, %v1658_v5  ;;  %v1736_v61 = vmul.f32 %v5794_v49, %v1624_v38  ;;  %v1784_v32 = vmul.f32 %v5795_v35, %v1624_v38  ;;  %v5301_v45 = vadd.f32 %v1801_v39, %v1785_v8 }
 0x22a   : > { %v5796_v51 = vmov %v5795_v35  ;;  %v5797_v54 = vmov %v5794_v49  ;;  %v5309_v25 = vadd.f32 %v1802_v11, %v1786_v28  ;;  %v5798_v58 = vunpack.c.h.bf16 %v5022_v33  ;;  %v5807_v49 = vld [vmem:[#allocation8_spill] sm:$0xff]  ;;  %v5808_v35 = vld [vmem:[#allocation9_spill] sm:$0xff] }
 0x22b   : > { %v1752_v59 = vmul.f32 %v5796_v51, %v1656_v60  ;;  %v1800_v21 = vmul.f32 %v5797_v54, %v1656_v60  ;;  %v5307_v34 = vsub.f32 %v1738_v63, %v1754_v26  ;;  %v5313_v5 = vsub.f32 %v1735_v22, %v1751_v10 }
 0x22c   : > { %v1796_v56 = vmul.f32 %v5798_v58, %v1652_v14  ;;  %v5315_v38 = vadd.f32 %v1799_v31, %v1783_v3  ;;  %v1875_v27 = vpack.c.bf16 %v5287_v44, %v5255_v2  ;;  %v1885_v36 = vpack.c.bf16 %v5309_v25, %v5301_v45  ;;  %v5809_v58 = vld [vmem:[#allocation14_spill] sm:$0xff] }
 0x22d   : > { %v1877_v55 = vpack.c.bf16 %v5307_v34, %v5299_v13  ;;  %v5323_v8 = vsub.f32 %v1736_v61, %v1752_v59  ;;  %v5325_v19 = vadd.f32 %v1800_v21, %v1784_v32  ;;  %v5327_v39 = vadd.f32 %v1798_v50, %v1782_v62 }
 0x22e   : > { %v1810_v33 = vadd.f32 %v5191_v15, %v5166_v7  ;;  %v1759_v14 = vsub.f32 %v5150_v57, %v5173_v48  ;;  %v1760_v22 = vsub.f32 %v5181_v16, %v5205_v41  ;;  %4084 = vmatprep.subr.bf16.mxu1 %v1885_v36  ;;  %v1807_v62 = vadd.f32 %v5177_v12, %v5155_v18 }
 0x22f   : > { %4052 = vmatprep.subr.bf16.mxu0 %v1877_v55  ;;  %v1876_v3 = vpack.c.bf16 %v5323_v8, %v5313_v5  ;;  %v1884_v9 = vpack.c.bf16 %v5325_v19, %v5315_v38  ;;  %4085 = vmatpush3.bf16.msra.mxu1 %v1885_v36  ;;  %v1808_v57 = vadd.f32 %v5216_v47, %v5185_v29  ;;  %v4363_v36 = vld [vmem:[#allocation2 + $0xf8] sm:$0xff]  }
 0x230   : > { %4053 = vmatpush3.bf16.msra.mxu0 %v1877_v55  ;;  %v1881_v7 = vpack.c.bf16 %v1810_v33, %v5212_v46  ;;  %v1872_v15 = vpack.c.bf16 %v1760_v22, %v1759_v14  ;;  %v1806_v48 = vadd.f32 %v5123_v20, %v5096_v43  ;;  %v1755_v16 = vsub.f32 %v5083_v42, %v5103_v40  ;;  %v5799_v43 = vld [vmem:[#allocation19_spill] sm:$0xff]  ;;  %v5800_v42 = vld [vmem:[#allocation10_spill] sm:$0xff] }
 0x231   : > { %4054 = vmatprep.subr.bf16.mxu0 %v1876_v3  ;;  %4086 = vmatprep.subr.bf16.mxu1 %v1884_v9  ;;  %v1756_v41 = vsub.f32 %v5111_v30, %v5137_v0  ;;  %v5351_v18 = vsub.f32 %v5247_v1, %v1748_v37  ;;  %v1880_v12 = vpack.c.bf16 %v1808_v57, %v1807_v62  ;;  %v5801_v0 = vld [vmem:[#allocation17_spill] sm:$0xff]  ;;  %v5802_v1 = vld [vmem:[#allocation15_spill] sm:$0xff]  ;;  %v5805_v37 = vld [vmem:[#allocation12_spill] sm:$0xff] }
 0x232   : > { %v1803_v50 = vadd.f32 %v5107_v6, %v5087_v52  ;;  %v1804_v29 = vadd.f32 %v5146_v53, %v5115_v4  ;;  %v1883_v47 = vpack.c.bf16 %v5327_v39, %v5267_v24  ;;  %v5360_v20 = vadd.f32 %v1796_v56, %v5799_v43  ;;  %v5803_v6 = vld [vmem:[#allocation16_spill] sm:$0xff]  ;;  %v5804_v4 = vld [vmem:[#allocation18_spill] sm:$0xff]  ;;  %v5810_v56 = vld [vmem:[#allocation11_spill] sm:$0xff] }
 0x233   : > { %v1879_v40 = vpack.c.bf16 %v1806_v48, %v5800_v42  ;;  %v1870_v63 = vpack.c.bf16 %v1756_v41, %v1755_v16  ;;  %4087 = vmatpush3.bf16.msra.mxu1 %v1884_v9  ;;  %v5365_v52 = vsub.f32 %v5802_v1, %v5801_v0  ;;  %v5369_v53 = vadd.f32 %v5804_v4, %v5803_v6  ;;  %v4343_v9 = vld [vmem:[#allocation2 + $0x90] sm:$0xff]   ;;  %v4356_v43 = vld [vmem:[%s5732_s4 + $0x88] sm:$0xff]   ;;  %v4362_v0 = vld [vmem:[%s5732_s4 + $0xb8] sm:$0xff]  }
 0x234   : > { %4055 = vmatpush3.bf16.msra.mxu0 %v1876_v3  ;;  %v1878_v30 = vpack.c.bf16 %v1804_v29, %v1803_v50  ;;  %4088 = vmatprep.subr.bf16.mxu1 %v1883_v47  ;;  %v1892_v10 = vadd.f32 %v5212_v46, %v5805_v37  ;;  %v1893_v31 = vadd.f32 %v1810_v33, %v5806_v17  ;;  %v4368_v1 = vld [vmem:[#allocation2 + $0xd0] sm:$0xff]   ;;  %v4370_v6 = vld [vmem:[#allocation2 + $0xc0] sm:$0xff]   ;;  %v4371_v4 = vld [vmem:[#allocation4 + $0xf8] sm:$0xff]  }
 0x235   : > { %4056 = vmatprep.subr.bf16.mxu0 %v1875_v27  ;;  %v1874_v28 = vpack.c.bf16 %v5351_v18, %v5365_v52  ;;  %v1882_v26 = vpack.c.bf16 %v5360_v20, %v5369_v53  ;;  %v1890_v23 = vadd.f32 %v1807_v62, %v1759_v14  ;;  %v1891_v11 = vadd.f32 %v1808_v57, %v1760_v22  ;;  %v4341_v14 = vld [vmem:[#allocation2 + $0x88] sm:$0xff]   ;;  %v4373_v37 = vld [vmem:[#allocation4 + $0xf0] sm:$0xff]   ;;  %v4377_v17 = vld [vmem:[#allocation4 + $0xe0] sm:$0xff]  }
 0x236   : > { %v5378_v60 = vpack.c.bf16 %v1893_v31, %v1892_v10  ;;  %v1888_v61 = vadd.f32 %v5800_v42, %v5807_v49  ;;  %v1889_v32 = vadd.f32 %v1806_v48, %v5808_v35  ;;  %v1886_v51 = vadd.f32 %v1803_v50, %v1755_v16  ;;  %v4342_v22 = vld [vmem:[#allocation4 + $0x88] sm:$0xff]   ;;  %v4353_v50 = vld [vmem:[#allocation2 + $0xb8] sm:$0xff]  }
 0x237   : > { %4089 = vmatpush3.bf16.msra.mxu1 %v1883_v47  ;;  %v5383_v46 = vpack.c.bf16 %v1891_v11, %v1890_v23  ;;  %v1887_v59 = vadd.f32 %v1804_v29, %v1756_v41  ;;  %v1900_v55 = vadd.f32 %v5301_v45, %v5299_v13  ;;  %v1899_v3 = vadd.f32 %v5325_v19, %v5323_v8  ;;  %v4364_v45 = vld [vmem:[#allocation2 + $0xf0] sm:$0xff]   ;;  %v4365_v57 = vld [vmem:[#allocation2 + $0xe8] sm:$0xff]   ;;  %v4354_v29 = vld [vmem:[#allocation4 + $0xb8] sm:$0xff]  }
 0x238   : > { %4057 = vmatpush3.bf16.msra.mxu0 %v1875_v27  ;;  %4090 = vmatprep.subr.bf16.mxu1 %v1882_v26  ;;  %v5385_v54 = vpack.c.bf16 %v1889_v32, %v1888_v61  ;;  %v1901_v27 = vadd.f32 %v5309_v25, %v5307_v34  ;;  %v1898_v34 = vadd.f32 %v5315_v38, %v5313_v5  ;;  %v4344_v25 = vld [vmem:[#allocation4 + $0x90] sm:$0xff]   ;;  %v4346_v5 = vld [vmem:[#allocation4 + $0x98] sm:$0xff]   ;;  %v4349_v48 = vld [vmem:[#allocation2 + $0xa8] sm:$0xff]  }
 0x239   : > { %4058 = vmatprep.subr.bf16.mxu0 %v1874_v28  ;;  %v5387_v21 = vpack.c.bf16 %v1887_v59, %v1886_v51  ;;  %v1897_v13 = vadd.f32 %v5327_v39, %v5287_v44  ;;  %v1896_v8 = vadd.f32 %v5267_v24, %v5255_v2  ;;  %v1895_v38 = vadd.f32 %v5360_v20, %v5351_v18  ;;  %v4348_v39 = vld [vmem:[#allocation4 + $0xa0] sm:$0xff]   ;;  %v4350_v16 = vld [vmem:[#allocation4 + $0xa8] sm:$0xff]   ;;  %v4351_v41 = vld [vmem:[#allocation2 + $0xb0] sm:$0xff]  }
 0x23a   : > { %v1909_v33 = vpack.c.bf16 %v1901_v27, %v1900_v55  ;;  %v1908_v62 = vpack.c.bf16 %v1899_v3, %v1898_v34  ;;  %v1894_v44 = vadd.f32 %v5369_v53, %v5365_v52  ;;  %v4366_v24 = vld [vmem:[#allocation2 + $0xe0] sm:$0xff]   ;;  %v4352_v18 = vld [vmem:[#allocation4 + $0xb0] sm:$0xff]   ;;  %v4358_v42 = vld [vmem:[%s5732_s4 + $0x98] sm:$0xff]  }
 0x23b   : > { %4091 = vmatpush3.bf16.msra.mxu1 %v1882_v26  ;;  %v1907_v19 = vpack.c.bf16 %v1897_v13, %v1896_v8  ;;  %v4355_v47 = vld [vmem:[%s5732_s4 + $0x80] sm:$0xff]   ;;  %v4357_v20 = vld [vmem:[%s5732_s4 + $0x90] sm:$0xff]   ;;  %v4369_v52 = vld [vmem:[#allocation2 + $0xc8] sm:$0xff]  }
 0x23c   : > { %4059 = vmatpush3.bf16.msra.mxu0 %v1874_v28  ;;  %4092 = vmatprep.subr.bf16.mxu1 %v1881_v7  ;;  %v1906_v2 = vpack.c.bf16 %v1895_v38, %v1894_v44  ;;  %v4372_v53 = vld [vmem:[%s5732_s4 + $0xf8] sm:$0xff]   ;;  %v4375_v10 = vld [vmem:[#allocation4 + $0xe8] sm:$0xff]   ;;  %v4381_v28 = vld [vmem:[#allocation4 + $0xd0] sm:$0xff]  }
 0x23d   : > { %4060 = vmatprep.subr.bf16.mxu0 %v5809_v58  ;;  %v4379_v31 = vld [vmem:[#allocation4 + $0xd8] sm:$0xff]   ;;  %v4383_v26 = vld [vmem:[#allocation4 + $0xc8] sm:$0xff]   ;;  %v4385_v23 = vld [vmem:[#allocation4 + $0xc0] sm:$0xff]  }
 0x23e   : > { %v4376_v13 = vld [vmem:[%s5732_s4 + $0xe8] sm:$0xff]  }
 0x23f   : > { %4093 = vmatpush3.bf16.msra.mxu1 %v1881_v7  ;;  %v4345_v7 = vld [vmem:[#allocation2 + $0x98] sm:$0xff]  }
 0x240   : > { %4061 = vmatpush3.bf16.msra.mxu0 %v5809_v58  ;;  %4094 = vmatprep.subr.bf16.mxu1 %v1880_v12 }
 0x241   : > { %4062 = vmatprep.subr.bf16.mxu0 %v1872_v15 }
 0x243   : > { %4095 = vmatpush3.bf16.msra.mxu1 %v1880_v12  ;;  %v4367_v12 = vld [vmem:[#allocation2 + $0xd8] sm:$0xff]  }
 0x244   : > { %4063 = vmatpush3.bf16.msra.mxu0 %v1872_v15  ;;  %4096 = vmatprep.subr.bf16.mxu1 %v1879_v40  ;;  %v4347_v15 = vld [vmem:[#allocation2 + $0xa0] sm:$0xff]  }
 0x245   : > { %4064 = vmatprep.subr.bf16.mxu0 %v5810_v56 }
 0x247   : > { %4097 = vmatpush3.bf16.msra.mxu1 %v1879_v40  ;;  %v4359_v40 = vld [vmem:[%s5732_s4 + $0xa0] sm:$0xff]  }
 0x248   : > { %4065 = vmatpush3.bf16.msra.mxu0 %v5810_v56  ;;  %4098 = vmatprep.subr.bf16.mxu1 %v1878_v30 }
 0x249   : > { %4066 = vmatprep.subr.bf16.mxu0 %v1870_v63 }
 0x24b   : > { %4099 = vmatpush3.bf16.msra.mxu1 %v1878_v30  ;;  %v4361_v30 = vld [vmem:[%s5732_s4 + $0xb0] sm:$0xff]  }
 0x24c   : > { %4067 = vmatpush3.bf16.msra.mxu0 %v1870_v63  ;;  %4148 = vmatprep.subr.bf16.mxu1 %v4363_v36  ;;  %v4360_v63 = vld [vmem:[%s5732_s4 + $0xa8] sm:$0xff]  }
 0x24d   : > { %4116 = vmatprep.subr.bf16.mxu0 %v1909_v33 }
 0x24e   : > { %4101 = vmatmul.mubr.bf16.vlgmr.msra.gmra.mxu1 %v4342_v22  ;;  %v4374_v22 = vld [vmem:[%s5732_s4 + $0xf0] sm:$0xff]  }
 0x24f   : > { %4069 = vmatmul.mubr.bf16.vlgmr.msra.gmra.mxu0 %v4341_v14  ;;  %4104 = vmatprep.mubr.bf16.mxu1 %v4344_v25 }
 0x250   : > { %4117 = vmatpush3.bf16.msra.mxu0 %v1909_v33  ;;  %4072 = vmatprep.mubr.bf16.mxu0 %v4343_v9 }
 0x251   : > { %4118 = vmatprep.subr.bf16.mxu0 %v1908_v62  ;;  %4149 = vmatpush3.bf16.msra.mxu1 %v4363_v36 }
 0x252   : > { %4150 = vmatprep.subr.bf16.mxu1 %v4364_v45 }
 0x254   : > { %4119 = vmatpush3.bf16.msra.mxu0 %v1908_v62 }
 0x255   : > { %4120 = vmatprep.subr.bf16.mxu0 %v1907_v19  ;;  %4151 = vmatpush3.bf16.msra.mxu1 %v4364_v45 }
 0x256   : > { %4105 = vmatmul.mubr.bf16.gmra.mxu1 %v4346_v5  ;;  %4152 = vmatprep.subr.bf16.mxu1 %v4365_v57 }
 0x257   : > { %4073 = vmatmul.mubr.bf16.gmra.mxu0 %v4345_v7  ;;  %4108 = vmatprep.mubr.bf16.mxu1 %v4348_v39 }
 0x258   : > { %4121 = vmatpush3.bf16.msra.mxu0 %v1907_v19  ;;  %4076 = vmatprep.mubr.bf16.mxu0 %v4347_v15 }
 0x259   : > { %4122 = vmatprep.subr.bf16.mxu0 %v1906_v2  ;;  %4153 = vmatpush3.bf16.msra.mxu1 %v4365_v57  ;;  %v4378_v57 = vld [vmem:[%s5732_s4 + $0xe0] sm:$0xff]  }
 0x25a   : > { %4154 = vmatprep.subr.bf16.mxu1 %v4366_v24 }
 0x25c   : > { %4123 = vmatpush3.bf16.msra.mxu0 %v1906_v2 }
 0x25d   : > { %4124 = vmatprep.subr.bf16.mxu0 %v5378_v60  ;;  %4155 = vmatpush3.bf16.msra.mxu1 %v4366_v24 }
 0x25e   : > { %4109 = vmatmul.mubr.bf16.gmra.mxu1 %v4350_v16  ;;  %4156 = vmatprep.subr.bf16.mxu1 %v4367_v12 }
 0x25f   : > { %4077 = vmatmul.mubr.bf16.gmra.mxu0 %v4349_v48  ;;  %4112 = vmatprep.mubr.bf16.mxu1 %v4352_v18  ;;  %v4380_v18 = vld [vmem:[%s5732_s4 + $0xd8] sm:$0xff]  }
 0x260   : > { %4125 = vmatpush3.bf16.msra.mxu0 %v5378_v60  ;;  %4080 = vmatprep.mubr.bf16.mxu0 %v4351_v41 }
 0x261   : > { %4126 = vmatprep.subr.bf16.mxu0 %v5383_v46  ;;  %4157 = vmatpush3.bf16.msra.mxu1 %v4367_v12 }
 0x262   : > { %4158 = vmatprep.subr.bf16.mxu1 %v4368_v1 }
 0x264   : > { %4127 = vmatpush3.bf16.msra.mxu0 %v5383_v46 }
 0x265   : > { %4128 = vmatprep.subr.bf16.mxu0 %v5385_v54  ;;  %4159 = vmatpush3.bf16.msra.mxu1 %v4368_v1 }
 0x266   : > { %4113 = vmatmul.mubr.bf16.gmra.mxu1 %v4354_v29  ;;  %4160 = vmatprep.subr.bf16.mxu1 %v4369_v52 }
 0x267   : > { %4081 = vmatmul.mubr.bf16.gmra.mxu0 %v4353_v50 }
 0x268   : > { %4129 = vmatpush3.bf16.msra.mxu0 %v5385_v54  ;;  %4132 = vmatprep.mubr.bf16.mxu0 %v4355_v47 }
 0x269   : > { %4130 = vmatprep.subr.bf16.mxu0 %v5387_v21  ;;  %4161 = vmatpush3.bf16.msra.mxu1 %v4369_v52 }
 0x26a   : > { %4162 = vmatprep.subr.bf16.mxu1 %v4370_v6 }
 0x26c   : > { %4131 = vmatpush3.bf16.msra.mxu0 %v5387_v21 }
 0x26d   : > { %4163 = vmatpush3.bf16.msra.mxu1 %v4370_v6  ;;  %4180 = vmatprep.subr.bf16.mxu0 %v4371_v4 }
 0x26e   : > { %4212 = vmatprep.subr.bf16.mxu1 %v4372_v53 }
 0x26f   : > { %4133 = vmatmul.mubr.bf16.vlgmr.msra.gmra.mxu0 %v4356_v43 }
 0x270   : > { %4136 = vmatprep.mubr.bf16.mxu0 %v4357_v20  ;;  %4181 = vmatpush3.bf16.msra.mxu0 %v4371_v4 }
 0x271   : > { %4182 = vmatprep.subr.bf16.mxu0 %v4373_v37 }
 0x274   : > { %4183 = vmatpush3.bf16.msra.mxu0 %v4373_v37 }
 0x275   : > { %4184 = vmatprep.subr.bf16.mxu0 %v4375_v10 }
 0x277   : > { %4137 = vmatmul.mubr.bf16.gmra.mxu0 %v4358_v42 }
 0x278   : > { %4140 = vmatprep.mubr.bf16.mxu0 %v4359_v40  ;;  %4185 = vmatpush3.bf16.msra.mxu0 %v4375_v10 }
 0x279   : > { %4186 = vmatprep.subr.bf16.mxu0 %v4377_v17 }
 0x27c   : > { %4187 = vmatpush3.bf16.msra.mxu0 %v4377_v17 }
 0x27d   : > { %4188 = vmatprep.subr.bf16.mxu0 %v4379_v31 }
 0x27f   : > { %4141 = vmatmul.mubr.bf16.gmra.mxu0 %v4360_v63 }
 0x280   : > { %4144 = vmatprep.mubr.bf16.mxu0 %v4361_v30  ;;  %4189 = vmatpush3.bf16.msra.mxu0 %v4379_v31  ;;  %v4382_v30 = vld [vmem:[%s5732_s4 + $0xd0] sm:$0xff]  }
 0x281   : > { %4190 = vmatprep.subr.bf16.mxu0 %v4381_v28 }
 0x284   : > { %4191 = vmatpush3.bf16.msra.mxu0 %v4381_v28 }
 0x285   : > { %4192 = vmatprep.subr.bf16.mxu0 %v4383_v26 }
 0x287   : > { %4145 = vmatmul.mubr.bf16.gmra.mxu0 %v4362_v0 }
 0x288   : > { %4193 = vmatpush3.bf16.msra.mxu0 %v4383_v26 }
 0x289   : > { %4194 = vmatprep.subr.bf16.mxu0 %v4385_v23 }
 0x28c   : > { %4195 = vmatpush3.bf16.msra.mxu0 %v4385_v23 }
 0x30e   : > { %v5446_v60 = vpop.f32.mrf.mxu1 }
 0x30f   : > { %v5444_v11 = vpop.f32.mrf.mxu0 }
 0x310   : > { %v5450_v61 = vpop.f32.mrf.mxu1  ;;  %v5474_v58 = vsub.f32 %v5444_v11, %v5446_v60 }
 0x311   : > { %v5448_v49 = vpop.f32.mrf.mxu0 }
 0x312   : > { %v5454_v32 = vpop.f32.mrf.mxu1  ;;  %v5466_v54 = vsub.f32 %v5448_v49, %v5450_v61 }
 0x313   : > { %v5452_v35 = vpop.f32.mrf.mxu0 }
 0x314   : > { %v5458_v46 = vsub.f32 %v5452_v35, %v5454_v32  ;;  %v5462_v59 = vpop.f32.mrf.mxu1 }
 0x315   : > { %v5460_v51 = vpop.f32.mrf.mxu0 }
 0x316   : > { %v5470_v21 = vsub.f32 %v5460_v51, %v5462_v59  ;;  %v5478_v27 = vpop.f32.mrf.mxu1  ;;  %v2445_v36 = vpack.c.bf16 %v5458_v46, %v5474_v58 }
 0x317   : > { %v5476_v56 = vpop.f32.mrf.mxu0 }
 0x318   : > { %v2444_v55 = vpack.c.bf16 %v5470_v21, %v5466_v54  ;;  %v5486_v14 = vpop.f32.mrf.mxu1  ;;  %v5516_v19 = vsub.f32 %v5476_v56, %v5478_v27 }
 0x319   : > { %v5484_v33 = vpop.f32.mrf.mxu0 }
 0x31a   : > { %4164 = vmatprep.mubr.bf16.mxu1 %v2444_v55  ;;  %v5493_v9 = vpop.f32.mrf.mxu1  ;;  %v5508_v45 = vsub.f32 %v5484_v33, %v5486_v14  ;;  %v4386_v55 = vld [vmem:[%s5732_s4 + $0xc0] sm:$0xff]  }
 0x31b   : > { %v5491_v3 = vpop.f32.mrf.mxu0  ;;  %4165 = vmatmul.mubr.bf16.vlgmr.msra.gmra.mxu1 %v2445_v36 }
 0x31c   : > { %4213 = vmatpush3.bf16.msra.mxu1 %v4372_v53  ;;  %v5497_v34 = vsub.f32 %v5491_v3, %v5493_v9  ;;  %v5501_v62 = vpop.f32.mrf.mxu1  ;;  %v4384_v53 = vld [vmem:[%s5732_s4 + $0xc8] sm:$0xff]  }
 0x31d   : > { %v5499_v25 = vpop.f32.mrf.mxu0  ;;  %4214 = vmatprep.subr.bf16.mxu1 %v4374_v22 }
 0x31e   : > { %v5512_v8 = vsub.f32 %v5499_v25, %v5501_v62  ;;  %v5520_v5 = vpop.f32.mrf.mxu1  ;;  %v2447_v15 = vpack.c.bf16 %v5497_v34, %v5516_v19 }
 0x31f   : > { %v5518_v7 = vpop.f32.mrf.mxu0 }
 0x320   : > { %v2446_v38 = vpack.c.bf16 %v5512_v8, %v5508_v45  ;;  %4215 = vmatpush3.bf16.msra.mxu1 %v4374_v22  ;;  %v5528_v39 = vpop.f32.mrf.mxu1  ;;  %v5558_v29 = vsub.f32 %v5518_v7, %v5520_v5 }
 0x321   : > { %v5526_v44 = vpop.f32.mrf.mxu0  ;;  %4216 = vmatprep.subr.bf16.mxu1 %v4376_v13 }
 0x322   : > { %4168 = vmatprep.mubr.bf16.mxu1 %v2446_v38  ;;  %v5535_v24 = vpop.f32.mrf.mxu1  ;;  %v5550_v12 = vsub.f32 %v5526_v44, %v5528_v39 }
 0x323   : > { %v5533_v2 = vpop.f32.mrf.mxu0  ;;  %4169 = vmatmul.mubr.bf16.gmra.mxu1 %v2447_v15 }
 0x324   : > { %4217 = vmatpush3.bf16.msra.mxu1 %v4376_v13  ;;  %v5539_v48 = vsub.f32 %v5533_v2, %v5535_v24  ;;  %v5543_v41 = vpop.f32.mrf.mxu1 }
 0x325   : > { %v5541_v16 = vpop.f32.mrf.mxu0  ;;  %4218 = vmatprep.subr.bf16.mxu1 %v4378_v57 }
 0x326   : > { %v5554_v50 = vsub.f32 %v5541_v16, %v5543_v41  ;;  %v5562_v43 = vpop.f32.mrf.mxu1  ;;  %v2449_v42 = vpack.c.bf16 %v5539_v48, %v5558_v29 }
 0x327   : > { %v5560_v47 = vpop.f32.mrf.mxu0 }
 0x328   : > { %v2448_v20 = vpack.c.bf16 %v5554_v50, %v5550_v12  ;;  %4219 = vmatpush3.bf16.msra.mxu1 %v4378_v57  ;;  %v5570_v63 = vpop.f32.mrf.mxu1  ;;  %v5600_v17 = vsub.f32 %v5560_v47, %v5562_v43 }
 0x329   : > { %v5568_v40 = vpop.f32.mrf.mxu0  ;;  %4220 = vmatprep.subr.bf16.mxu1 %v4380_v18 }
 0x32a   : > { %4172 = vmatprep.mubr.bf16.mxu1 %v2448_v20  ;;  %v5577_v1 = vpop.f32.mrf.mxu1  ;;  %v5592_v37 = vsub.f32 %v5568_v40, %v5570_v63 }
 0x32b   : > { %v5575_v0 = vpop.f32.mrf.mxu0  ;;  %4173 = vmatmul.mubr.bf16.gmra.mxu1 %v2449_v42 }
 0x32c   : > { %4221 = vmatpush3.bf16.msra.mxu1 %v4380_v18  ;;  %v5581_v52 = vsub.f32 %v5575_v0, %v5577_v1  ;;  %v5585_v4 = vpop.f32.mrf.mxu1 }
 0x32d   : > { %v5583_v6 = vpop.f32.mrf.mxu0  ;;  %4222 = vmatprep.subr.bf16.mxu1 %v4382_v30 }
 0x32e   : > { %v5596_v10 = vsub.f32 %v5583_v6, %v5585_v4  ;;  %v2451_v26 = vpack.c.bf16 %v5581_v52, %v5600_v17 }
 0x32f   : > { %v4134_v31 = vpop.f32.mrf.mxu0 }
 0x330   : > { %v2450_v28 = vpack.c.bf16 %v5596_v10, %v5592_v37  ;;  %4223 = vmatpush3.bf16.msra.mxu1 %v4382_v30  ;;  %v2363_v22 = vsub.f32 %v4134_v31, %v5444_v11 }
 0x331   : > { %v2282_v23 = vpop.f32.mrf.mxu0  ;;  %4224 = vmatprep.subr.bf16.mxu1 %v4384_v53 }
 0x332   : > { %v2361_v36 = vsub.f32 %v2282_v23, %v5448_v49  ;;  %4176 = vmatprep.mubr.bf16.mxu1 %v2450_v28  ;;  %v2379_v42 = vsub.f32 %v2363_v22, %v5446_v60 }
 0x333   : > { %v4135_v13 = vpop.f32.mrf.mxu0  ;;  %4177 = vmatmul.mubr.bf16.gmra.mxu1 %v2451_v26 }
 0x334   : > { %v2364_v38 = vsub.f32 %v4135_v13, %v5452_v35  ;;  %4225 = vmatpush3.bf16.msra.mxu1 %v4384_v53  ;;  %v2377_v57 = vsub.f32 %v2361_v36, %v5450_v61  ;;  %v2462_v61 = vadd.f32 %v2379_v42, %v5474_v58 }
 0x335   : > { %v2285_v15 = vpop.f32.mrf.mxu0  ;;  %4226 = vmatprep.subr.bf16.mxu1 %v4386_v55 }
 0x336   : > { %v2380_v18 = vsub.f32 %v2364_v38, %v5454_v32  ;;  %v2362_v20 = vsub.f32 %v2285_v15, %v5460_v51  ;;  %v2460_v35 = vadd.f32 %v2377_v57, %v5466_v54 }
 0x337   : > { %v4138_v30 = vpop.f32.mrf.mxu0 }
 0x338   : > { %v2378_v49 = vsub.f32 %v2362_v20, %v5462_v59  ;;  %4227 = vmatpush3.bf16.msra.mxu1 %v4386_v55  ;;  %v2463_v11 = vadd.f32 %v2380_v18, %v5458_v46  ;;  %v2367_v32 = vsub.f32 %v4138_v30, %v5476_v56  ;;  %v2453_v60 = vpack.c.bf16 %v2380_v18, %v2379_v42 }
 0x339   : > { %v2298_v31 = vpop.f32.mrf.mxu0 }
 0x33a   : > { %v2461_v53 = vadd.f32 %v2378_v49, %v5470_v21  ;;  %v2365_v28 = vsub.f32 %v2298_v31, %v5484_v33  ;;  %v2452_v26 = vpack.c.bf16 %v2378_v49, %v2377_v57  ;;  %v2477_v55 = vpack.c.bf16 %v2463_v11, %v2462_v61 }
 0x33b   : > { %v4139_v51 = vpop.f32.mrf.mxu0  ;;  %v2383_v58 = vsub.f32 %v2367_v32, %v5478_v27 }
 0x33c   : > { %v2368_v23 = vsub.f32 %v4139_v51, %v5491_v3  ;;  %v2476_v59 = vpack.c.bf16 %v2461_v53, %v2460_v35  ;;  %4196 = vmatprep.mubr.bf16.mxu0 %v2452_v26  ;;  %v2381_v36 = vsub.f32 %v2365_v28, %v5486_v14 }
 0x33d   : > { %v2301_v46 = vpop.f32.mrf.mxu0  ;;  %4197 = vmatmul.mubr.bf16.vlgmr.msra.gmra.mxu0 %v2453_v60 }
 0x33e   : > { %v2384_v54 = vsub.f32 %v2368_v23, %v5493_v9  ;;  %v2366_v21 = vsub.f32 %v2301_v46, %v5499_v25  ;;  %4228 = vmatprep.mubr.bf16.mxu1 %v2476_v59  ;;  %v2464_v13 = vadd.f32 %v2381_v36, %v5508_v45  ;;  %v2466_v25 = vadd.f32 %v2383_v58, %v5516_v19 }
 0x33f   : > { %v4142_v56 = vpop.f32.mrf.mxu0  ;;  %4229 = vmatmul.mubr.bf16.vlgmr.msra.gmra.mxu1 %v2477_v55 }
 0x340   : > { %v2382_v33 = vsub.f32 %v2366_v21, %v5501_v62  ;;  %v2467_v3 = vadd.f32 %v2384_v54, %v5497_v34  ;;  %v2371_v15 = vsub.f32 %v4142_v56, %v5518_v7  ;;  %v2455_v18 = vpack.c.bf16 %v2384_v54, %v2383_v58 }
 0x341   : > { %v2314_v22 = vpop.f32.mrf.mxu0 }
 0x342   : > { %v2465_v38 = vadd.f32 %v2382_v33, %v5512_v8  ;;  %v2369_v14 = vsub.f32 %v2314_v22, %v5526_v44  ;;  %v2454_v9 = vpack.c.bf16 %v2382_v33, %v2381_v36  ;;  %v2479_v34 = vpack.c.bf16 %v2467_v3, %v2466_v25 }
 0x343   : > { %v4143_v57 = vpop.f32.mrf.mxu0  ;;  %v2387_v19 = vsub.f32 %v2371_v15, %v5520_v5 }
 0x344   : > { %v2372_v27 = vsub.f32 %v4143_v57, %v5533_v2  ;;  %4200 = vmatprep.mubr.bf16.mxu0 %v2454_v9  ;;  %v2478_v62 = vpack.c.bf16 %v2465_v38, %v2464_v13  ;;  %v2385_v42 = vsub.f32 %v2369_v14, %v5528_v39 }
 0x345   : > { %v2317_v20 = vpop.f32.mrf.mxu0  ;;  %4201 = vmatmul.mubr.bf16.gmra.mxu0 %v2455_v18 }
 0x346   : > { %v2388_v45 = vsub.f32 %v2372_v27, %v5535_v24  ;;  %v2370_v8 = vsub.f32 %v2317_v20, %v5541_v16  ;;  %4232 = vmatprep.mubr.bf16.mxu1 %v2478_v62  ;;  %v2468_v49 = vadd.f32 %v2385_v42, %v5550_v12  ;;  %v2470_v16 = vadd.f32 %v2387_v19, %v5558_v29 }
 0x347   : > { %v4146_v44 = vpop.f32.mrf.mxu0  ;;  %4233 = vmatmul.mubr.bf16.gmra.mxu1 %v2479_v34 }
 0x348   : > { %v2386_v7 = vsub.f32 %v2370_v8, %v5543_v41  ;;  %v2471_v2 = vadd.f32 %v2388_v45, %v5539_v48  ;;  %v2375_v31 = vsub.f32 %v4146_v44, %v5560_v47  ;;  %v2457_v53 = vpack.c.bf16 %v2388_v45, %v2387_v19 }
 0x349   : > { %v2330_v30 = vpop.f32.mrf.mxu0 }
 0x34a   : > { %v2469_v11 = vadd.f32 %v2386_v7, %v5554_v50  ;;  %v2373_v39 = vsub.f32 %v2330_v30, %v5568_v40  ;;  %v2456_v24 = vpack.c.bf16 %v2386_v7, %v2385_v42  ;;  %v2481_v48 = vpack.c.bf16 %v2471_v2, %v2470_v16 }
 0x34b   : > { %v4147_v35 = vpop.f32.mrf.mxu0  ;;  %v2391_v29 = vsub.f32 %v2375_v31, %v5562_v43 }
 0x34c   : > { %v2376_v5 = vsub.f32 %v4147_v35, %v5575_v0  ;;  %4204 = vmatprep.mubr.bf16.mxu0 %v2456_v24  ;;  %v2480_v41 = vpack.c.bf16 %v2469_v11, %v2468_v49  ;;  %v2389_v61 = vsub.f32 %v2373_v39, %v5570_v63 }
 0x34d   : > { %v2333_v28 = vpop.f32.mrf.mxu0  ;;  %4205 = vmatmul.mubr.bf16.gmra.mxu0 %v2457_v53  ;;  %v2474_v63 = vadd.f32 %v2391_v29, %v5600_v17 }
 0x34e   : > { %v2392_v12 = vsub.f32 %v2376_v5, %v5577_v1  ;;  %v2374_v50 = vsub.f32 %v2333_v28, %v5583_v6  ;;  %4236 = vmatprep.mubr.bf16.mxu1 %v2480_v41  ;;  %v2472_v0 = vadd.f32 %v2389_v61, %v5592_v37 }
 0x34f   : > { %4237 = vmatmul.mubr.bf16.gmra.mxu1 %v2481_v48 }
 0x350   : > { %v2390_v47 = vsub.f32 %v2374_v50, %v5585_v4  ;;  %v2475_v40 = vadd.f32 %v2392_v12, %v5581_v52  ;;  %v2459_v1 = vpack.c.bf16 %v2392_v12, %v2391_v29 }
 0x352   : > { %v2473_v32 = vadd.f32 %v2390_v47, %v5596_v10  ;;  %v2458_v51 = vpack.c.bf16 %v2390_v47, %v2389_v61  ;;  %v2483_v6 = vpack.c.bf16 %v2475_v40, %v2474_v63 }
 0x354   : > { %4208 = vmatprep.mubr.bf16.mxu0 %v2458_v51  ;;  %v2482_v26 = vpack.c.bf16 %v2473_v32, %v2472_v0 }
 0x355   : > { %4209 = vmatmul.mubr.bf16.gmra.mxu0 %v2459_v1 }
 0x356   : > { %4240 = vmatprep.mubr.bf16.mxu1 %v2482_v26 }
 0x357   : > { %4241 = vmatmul.mubr.bf16.gmra.mxu1 %v2483_v6 }
 0x3db   : > { %v4166_v43 = vpop.f32.mrf.mxu1 }
 0x3dd   : > { %v2566_v60 = vpop.f32.mrf.mxu1 }
 0x3df   : > { %v4167_v23 = vpop.f32.mrf.mxu1 }
 0x3e1   : > { %v2569_v4 = vpop.f32.mrf.mxu1 }
 0x3e3   : > { %v4170_v59 = vpop.f32.mrf.mxu1 }
 0x3e5   : > { %v5657_v52 = vpop.f32.mrf.mxu1 }
 0x3e7   : > { %v4171_v37 = vpop.f32.mrf.mxu1 }
 0x3e9   : > { %v5659_v55 = vpop.f32.mrf.mxu1 }
 0x3eb   : > { %v5661_v10 = vpop.f32.mrf.mxu1 }
 0x3ed   : > { %v5663_v17 = vpop.f32.mrf.mxu1 }
 0x3ef   : > { %v5665_v46 = vpop.f32.mrf.mxu1 }
 0x3f1   : > { %v5667_v36 = vpop.f32.mrf.mxu1 }
 0x3f3   : > { %v5669_v54 = vpop.f32.mrf.mxu1 }
 0x3f5   : > { %v5671_v21 = vpop.f32.mrf.mxu1 }
 0x3f7   : > { %v5673_v58 = vpop.f32.mrf.mxu1 }
 0x3f9   : > { %v5675_v56 = vpop.f32.mrf.mxu1 }
 0x3fd   : > { %v4198_v33 = vpop.f32.mrf.mxu0 }
 0x3fe   : > { %v2921_v9 = vsub.f32 %v4166_v43, %v4198_v33 }
 0x3ff   : > { %v4230_v3 = vpop.f32.mrf.mxu1  ;;  %v2711_v22 = vpop.f32.mrf.mxu0 }
 0x400   : > { %v2937_v38 = vsub.f32 %v4230_v3, %v4166_v43  ;;  %v2919_v62 = vsub.f32 %v2566_v60, %v2711_v22 }
 0x401   : > { %v2856_v13 = vpop.f32.mrf.mxu1  ;;  %v4199_v14 = vpop.f32.mrf.mxu0 }
 0x402   : > { %v2922_v25 = vsub.f32 %v4167_v23, %v4199_v14  ;;  %v2935_v57 = vsub.f32 %v2856_v13, %v2566_v60  ;;  %v2953_v45 = vsub.f32 %v2937_v38, %v4198_v33 }
 0x403   : > { %v4231_v15 = vpop.f32.mrf.mxu1  ;;  %v2714_v27 = vpop.f32.mrf.mxu0 }
 0x404   : > { %v2938_v18 = vsub.f32 %v4231_v15, %v4167_v23  ;;  %v3568_v20 = vpack.c.bf16 %v2922_v25, %v2921_v9  ;;  %v2920_v34 = vsub.f32 %v2569_v4, %v2714_v27  ;;  %v2951_v30 = vsub.f32 %v2935_v57, %v2711_v22 }
 0x405   : > { %v2859_v42 = vpop.f32.mrf.mxu1  ;;  %v4202_v19 = vpop.f32.mrf.mxu0 }
 0x406   : > { %v2954_v8 = vsub.f32 %v2938_v18, %v4199_v14  ;;  %v2936_v44 = vsub.f32 %v2859_v42, %v2569_v4  ;;  %3654 = vst [vmem:[%s5681_s26 + $0x8] sm:$0xff] %v3568_v20   ;;  %v3563_v7 = vpack.c.bf16 %v2920_v34, %v2919_v62  ;;  %v2925_v5 = vsub.f32 %v4170_v59, %v4202_v19 }
 0x407   : > { %v4234_v2 = vpop.f32.mrf.mxu1  ;;  %v2727_v39 = vpop.f32.mrf.mxu0 }
 0x408   : > { %v3608_v49 = vpack.c.bf16 %v2954_v8, %v2953_v45  ;;  %v2952_v11 = vsub.f32 %v2936_v44, %v2714_v27  ;;  %3564 = vst [vmem:[%s5681_s26] sm:$0xff] %v3563_v7   ;;  %v2941_v31 = vsub.f32 %v4234_v2, %v4170_v59  ;;  %v2923_v12 = vsub.f32 %v5657_v52, %v2727_v39 }
 0x409   : > { %v2872_v24 = vpop.f32.mrf.mxu1  ;;  %v4203_v35 = vpop.f32.mrf.mxu0 }
 0x40a   : > { %3661 = vst [vmem:[%s5688_s30 + $0x8] sm:$0xff] %v3608_v49   ;;  %v3603_v16 = vpack.c.bf16 %v2952_v11, %v2951_v30  ;;  %v2926_v53 = vsub.f32 %v4171_v37, %v4203_v35  ;;  %v2939_v28 = vsub.f32 %v2872_v24, %v5657_v52  ;;  %v2957_v40 = vsub.f32 %v2941_v31, %v4202_v19 }
 0x40b   : > { %v4235_v41 = vpop.f32.mrf.mxu1  ;;  %v2730_v48 = vpop.f32.mrf.mxu0 }
 0x40c   : > { %3604 = vst [vmem:[%s5688_s30] sm:$0xff] %v3603_v16   ;;  %v2942_v61 = vsub.f32 %v4235_v41, %v4171_v37  ;;  %v3578_v50 = vpack.c.bf16 %v2926_v53, %v2925_v5  ;;  %v2924_v29 = vsub.f32 %v5659_v55, %v2730_v48  ;;  %v2955_v26 = vsub.f32 %v2939_v28, %v2727_v39 }
 0x40d   : > { %v2875_v47 = vpop.f32.mrf.mxu1  ;;  %v4206_v32 = vpop.f32.mrf.mxu0 }
 0x40e   : > { %v2958_v0 = vsub.f32 %v2942_v61, %v4203_v35  ;;  %v2940_v51 = vsub.f32 %v2875_v47, %v5659_v55  ;;  %3656 = vst [vmem:[%s5681_s26 + $0x18] sm:$0xff] %v3578_v50   ;;  %v3573_v63 = vpack.c.bf16 %v2924_v29, %v2923_v12  ;;  %v2929_v37 = vsub.f32 %v5661_v10, %v4206_v32 }
 0x40f   : > { %v4238_v1 = vpop.f32.mrf.mxu1  ;;  %v2743_v60 = vpop.f32.mrf.mxu0 }
 0x410   : > { %v3618_v6 = vpack.c.bf16 %v2958_v0, %v2957_v40  ;;  %v2956_v43 = vsub.f32 %v2940_v51, %v2730_v48  ;;  %3655 = vst [vmem:[%s5681_s26 + $0x10] sm:$0xff] %v3573_v63   ;;  %v2945_v59 = vsub.f32 %v4238_v1, %v5661_v10  ;;  %v2927_v38 = vsub.f32 %v5663_v17, %v2743_v60 }
 0x411   : > { %v2888_v23 = vpop.f32.mrf.mxu1  ;;  %v4207_v52 = vpop.f32.mrf.mxu0 }
 0x412   : > { %3663 = vst [vmem:[%s5688_s30 + $0x18] sm:$0xff] %v3618_v6   ;;  %v3613_v4 = vpack.c.bf16 %v2956_v43, %v2955_v26  ;;  %v2930_v55 = vsub.f32 %v5665_v46, %v4207_v52  ;;  %v2943_v3 = vsub.f32 %v2888_v23, %v5663_v17  ;;  %v2961_v15 = vsub.f32 %v2945_v59, %v4206_v32 }
 0x413   : > { %v4239_v33 = vpop.f32.mrf.mxu1  ;;  %v2746_v22 = vpop.f32.mrf.mxu0 }
 0x414   : > { %3662 = vst [vmem:[%s5688_s30 + $0x10] sm:$0xff] %v3613_v4   ;;  %v2946_v13 = vsub.f32 %v4239_v33, %v5665_v46  ;;  %v3588_v14 = vpack.c.bf16 %v2930_v55, %v2929_v37  ;;  %v2928_v9 = vsub.f32 %v5667_v36, %v2746_v22  ;;  %v2959_v20 = vsub.f32 %v2943_v3, %v2743_v60 }
 0x415   : > { %v2891_v25 = vpop.f32.mrf.mxu1  ;;  %v4210_v10 = vpop.f32.mrf.mxu0 }
 0x416   : > { %v2962_v57 = vsub.f32 %v2946_v13, %v4207_v52  ;;  %v2944_v27 = vsub.f32 %v2891_v25, %v5667_v36  ;;  %3658 = vst [vmem:[%s5681_s26 + $0x28] sm:$0xff] %v3588_v14   ;;  %v3583_v18 = vpack.c.bf16 %v2928_v9, %v2927_v38  ;;  %v2933_v44 = vsub.f32 %v5669_v54, %v4210_v10 }
 0x417   : > { %v4242_v62 = vpop.f32.mrf.mxu1  ;;  %v2759_v42 = vpop.f32.mrf.mxu0 }
 0x418   : > { %v3628_v34 = vpack.c.bf16 %v2962_v57, %v2961_v15  ;;  %v2960_v46 = vsub.f32 %v2944_v27, %v2746_v22  ;;  %3657 = vst [vmem:[%s5681_s26 + $0x20] sm:$0xff] %v3583_v18   ;;  %v2949_v8 = vsub.f32 %v4242_v62, %v5669_v54  ;;  %v2931_v11 = vsub.f32 %v5671_v21, %v2759_v42 }
 0x419   : > { %v2904_v17 = vpop.f32.mrf.mxu1  ;;  %v4211_v19 = vpop.f32.mrf.mxu0 }
 0x41a   : > { %3665 = vst [vmem:[%s5688_s30 + $0x28] sm:$0xff] %v3628_v34   ;;  %v3623_v45 = vpack.c.bf16 %v2960_v46, %v2959_v20  ;;  %v2934_v36 = vsub.f32 %v5673_v58, %v4211_v19  ;;  %v2947_v2 = vsub.f32 %v2904_v17, %v5671_v21  ;;  %v2965_v31 = vsub.f32 %v2949_v8, %v4210_v10 }
 0x41b   : > { %v4243_v7 = vpop.f32.mrf.mxu1  ;;  %v2762_v30 = vpop.f32.mrf.mxu0 }
 0x41c   : > { %3664 = vst [vmem:[%s5688_s30 + $0x20] sm:$0xff] %v3623_v45   ;;  %v2950_v49 = vsub.f32 %v4243_v7, %v5673_v58  ;;  %v3598_v39 = vpack.c.bf16 %v2934_v36, %v2933_v44  ;;  %v2932_v24 = vsub.f32 %v5675_v56, %v2762_v30  ;;  %v2963_v53 = vsub.f32 %v2947_v2, %v2759_v42 }
 0x41d   : > { %v2907_v16 = vpop.f32.mrf.mxu1 }
 0x41e   : > { %v2966_v54 = vsub.f32 %v2950_v49, %v4211_v19  ;;  %v2948_v35 = vsub.f32 %v2907_v16, %v5675_v56  ;;  %3660 = vst [vmem:[%s5681_s26 + $0x38] sm:$0xff] %v3598_v39   ;;  %v3593_v5 = vpack.c.bf16 %v2932_v24, %v2931_v11 }
 0x420   : > { %v3638_v41 = vpack.c.bf16 %v2966_v54, %v2965_v31  ;;  %v2964_v28 = vsub.f32 %v2948_v35, %v2762_v30  ;;  %3659 = vst [vmem:[%s5681_s26 + $0x30] sm:$0xff] %v3593_v5  }
 0x422   : > { %3667 = vst [vmem:[%s5688_s30 + $0x38] sm:$0xff] %v3638_v41   ;;  %v3633_v48 = vpack.c.bf16 %v2964_v28, %v2963_v53 }
 0x424   : > { %3666 = vst [vmem:[%s5688_s30 + $0x30] sm:$0xff] %v3633_v48  }
 0x425 PF: > { %s21_s27 = sadd.s32 1, %s4469_s27  }
 0x426   : > { %p18_p2 = scmp.ge.s32.totalorder %s21_s27, 4  }
 0x428   :  { %20 = sbr.rel (!%p18_p2) target bundleno = 2 (0x2), region = 111 }
 0x42d   :  { %3164 = vsyncpa [#allocation3], 1 }
 0x42e   :  { %3166 = vsyncpa [#allocation3 + $0x1], 1 }
 0x42f   :  { %3167 = vsyncpa [#allocation5], 1 }

</bundles_post_ra>
